<compile_context>
chip_gen: v7x
topology: tpu7x:2x2x1
jax: 0.10.0
libtpu: 0.0.40
codegen_flags: <defaults>
</compile_context>

<pallas_src>
import functools

import jax
import jax.numpy as jnp
from jax import lax
from jax.experimental import pallas as pl
from jax.experimental.pallas import tpu as pltpu


LEAK = 0.2
BN_EPS = 1e-5
_MAX_TILE_P = 4096                     # pixels per grid step (lane axis, mult of 128)
_VMEM_LIMIT = 48 * 1024 * 1024         # explicit scoped-VMEM cap (safe on v5e/v6e/v7x)


def _leaky_relu(x, slope=LEAK):
    return jnp.where(x >= 0, x, slope * x)


def _round_up(x, m):
    return (x + m - 1) // m * m


def _bf16(a):
    return a.astype(jnp.bfloat16)


def _conv12(x_ref, w1_ref, b1_ref, w2_ref):
    """conv1 + bias + leaky_relu + conv2 on one (C_in, TILE_P) pixel tile.

    Transposed layout: channels on sublanes, pixels on lanes. bf16 MXU operands,
    f32 accumulation, elementwise in f32 (v5e VPU has no bf16).
    """
    x = _bf16(x_ref[...])                                        # (C_in, TP)
    h1 = jnp.dot(_bf16(w1_ref[...]), x,
                 preferred_element_type=jnp.float32)             # (ndf, TP) f32
    h1 = _leaky_relu(h1 + b1_ref[...])
    h2 = jnp.dot(_bf16(w2_ref[...]), _bf16(h1),
                 preferred_element_type=jnp.float32)             # (2ndf, TP) f32
    return h2


def _bn_stats_kernel(x_ref, w1_ref, b1_ref, w2_ref, sum_ref, sq_ref,
                     *, tile_p, p_valid, p_pad):
    """Pass 1: accumulate per-channel sum and sum-of-squares of h2 over all pixels."""
    i = pl.program_id(0)

    @pl.when(i == 0)
    def _():
        sum_ref[...] = jnp.zeros_like(sum_ref)
        sq_ref[...] = jnp.zeros_like(sq_ref)

    h2 = _conv12(x_ref, w1_ref, b1_ref, w2_ref)                  # (2ndf, TP) f32
    if p_pad != p_valid:
        # Mask padded pixel columns so BatchNorm stats match the un-padded input.
        col = i * tile_p + lax.broadcasted_iota(jnp.int32, h2.shape, 1)
        h2 = jnp.where(col < p_valid, h2, 0.0)

    sum_ref[...] += jnp.sum(h2, axis=1, keepdims=True)           # (2ndf, 1)
    sq_ref[...] += jnp.sum(h2 * h2, axis=1, keepdims=True)       # (2ndf, 1)


def _bn_apply_kernel(x_ref, w1_ref, b1_ref, w2_ref, scale_ref, shift_ref,
                     w3_ref, out_ref):
    """Pass 2: recompute conv1/conv2, apply folded BN, leaky_relu, conv3."""
    h2 = _conv12(x_ref, w1_ref, b1_ref, w2_ref)                  # (2ndf, TP) f32
    h3 = _leaky_relu(h2 * scale_ref[...] + shift_ref[...])       # BN folded, f32
    out = jnp.dot(_bf16(w3_ref[...]), _bf16(h3),
                  preferred_element_type=jnp.float32)            # (1, TP) lane-dense
    out_ref[...] = out.astype(out_ref.dtype)


def init_pixel_discriminator_params(key, input_nc, ndf=64, dtype=jnp.float32):
    """Synthetic parameters matching the PyTorch module's shapes.

    PyTorch shapes -> stored matmul form (channels-first / transposed layout):
      conv1.weight (ndf, in, 1, 1)   -> w1 (ndf, in)
      conv1.bias   (ndf,)            -> b1 (ndf, 1)
      conv2.weight (2ndf, ndf, 1, 1) -> w2 (2ndf, ndf)      (bias=False: BN follows)
      bn.weight / bn.bias (2ndf,)    -> gamma / beta (2ndf, 1)
      conv3.weight (1, 2ndf, 1, 1)   -> w3 (1, 2ndf)        (bias=False)
    """
    k1, k2, k3, k4 = jax.random.split(key, 4)
    w1 = jax.random.normal(k1, (ndf, input_nc), dtype) * 0.1
    b1 = jax.random.normal(k2, (ndf, 1), dtype) * 0.1
    w2 = jax.random.normal(k3, (2 * ndf, ndf), dtype) * 0.1
    gamma = jnp.ones((2 * ndf, 1), dtype)
    beta = jnp.zeros((2 * ndf, 1), dtype)
    w3 = jax.random.normal(k4, (1, 2 * ndf), dtype) * 0.1
    return dict(w1=w1, b1=b1, w2=w2, gamma=gamma, beta=beta, w3=w3)


@jax.jit
def pixel_discriminator_forward(x_nchw, params):
    """x_nchw: (N, C_in, H, W). Returns (N, 1, H, W), like the PyTorch module."""
    N, C, H, W = x_nchw.shape
    P = N * H * W
    ndf2 = params["w2"].shape[0]
    f32 = jnp.float32

    tile_p = min(_MAX_TILE_P, _round_up(P, 128))
    p_pad = _round_up(P, tile_p)
    nt = p_pad // tile_p

    # NCHW is already channel-major: only an N<->C swap is needed, then flatten
    # pixels onto the lane axis -> (C_in, P). Zero-pad pixels to a tile multiple.
    x_t = jnp.transpose(x_nchw, (1, 0, 2, 3)).reshape(C, P)
    if p_pad != P:
        x_t = jnp.pad(x_t, ((0, 0), (0, p_pad - P)))

    w1 = params["w1"].astype(f32)
    b1 = params["b1"].astype(f32)
    w2 = params["w2"].astype(f32)
    w3 = params["w3"].astype(f32)

    def const(shape):  # weight-style operand: resident in VMEM across the grid
        return pl.BlockSpec(shape, lambda i: (0, 0))

    x_spec = pl.BlockSpec((C, tile_p), lambda i: (0, i))

    # ---- pass 1: global per-channel sum / sum-of-squares of h2 ----
    s, ss = pl.pallas_call(
        functools.partial(_bn_stats_kernel, tile_p=tile_p, p_valid=P, p_pad=p_pad),
        grid=(nt,),
        in_specs=[x_spec, const(w1.shape), const(b1.shape), const(w2.shape)],
        out_specs=(const((ndf2, 1)), const((ndf2, 1))),
        out_shape=(jax.ShapeDtypeStruct((ndf2, 1), f32),
                   jax.ShapeDtypeStruct((ndf2, 1), f32)),
        compiler_params=pltpu.CompilerParams(
            dimension_semantics=("arbitrary",),          # resident accumulators
            vmem_limit_bytes=_VMEM_LIMIT),
    )(x_t, w1, b1, w2)

    # Fold training-mode BatchNorm (biased variance, eps=1e-5) into scale/shift.
    mean = s / P
    var = jnp.maximum(ss / P - mean * mean, 0.0)
    scale = params["gamma"].astype(f32) * lax.rsqrt(var + BN_EPS)
    shift = params["beta"].astype(f32) - mean * scale

    # ---- pass 2: normalize + leaky_relu + conv3, lane-dense (1, P) output ----
    out_t = pl.pallas_call(
        _bn_apply_kernel,
        grid=(nt,),
        in_specs=[x_spec, const(w1.shape), const(b1.shape), const(w2.shape),
                  const((ndf2, 1)), const((ndf2, 1)), const(w3.shape)],
        out_specs=pl.BlockSpec((1, tile_p), lambda i: (0, i)),
        out_shape=jax.ShapeDtypeStruct((1, p_pad), x_nchw.dtype),
        compiler_params=pltpu.CompilerParams(
            dimension_semantics=("parallel",),           # both TCs on v7x
            vmem_limit_bytes=_VMEM_LIMIT),
    )(x_t, w1, b1, w2, scale, shift, w3)

    # (1, P) -> (1, N, H, W) -> (N, 1, H, W)
    return jnp.transpose(out_t[:, :P].reshape(1, N, H, W), (1, 0, 2, 3))


def _reference_forward(x_nchw, params):
    """Pure-JAX reference with the same bf16-MXU / f32-BN numerics (sanity check)."""
    N, C, H, W = x_nchw.shape
    f32 = jnp.float32
    x = jnp.transpose(x_nchw, (1, 0, 2, 3)).reshape(C, -1).astype(f32)
    h1 = jnp.dot(_bf16(params["w1"]), _bf16(x), preferred_element_type=f32)
    h1 = _leaky_relu(h1 + params["b1"].astype(f32))
    h2 = jnp.dot(_bf16(params["w2"]), _bf16(h1), preferred_element_type=f32)
    mean = jnp.mean(h2, axis=1, keepdims=True)
    var = jnp.mean((h2 - mean) ** 2, axis=1, keepdims=True)
    h2n = (h2 - mean) * lax.rsqrt(var + BN_EPS)
    h2n = h2n * params["gamma"].astype(f32) + params["beta"].astype(f32)
    h3 = _leaky_relu(h2n)
    out = jnp.dot(_bf16(params["w3"]), _bf16(h3), preferred_element_type=f32)
    return jnp.transpose(out.reshape(1, N, H, W), (1, 0, 2, 3)).astype(x_nchw.dtype)


if __name__ == "__main__":
    key = jax.random.PRNGKey(0)
    k_x, k_p = jax.random.split(key)

    # Small shapes consistent with the module: batch=2, input_nc=4, 16x16 spatial.
    N, input_nc, H, W = 2, 4, 16, 16
    ndf = 64

    x = jax.random.normal(k_x, (N, input_nc, H, W), jnp.float32)
    params = init_pixel_discriminator_params(k_p, input_nc, ndf)

    out = jax.block_until_ready(pixel_discriminator_forward(x, params))
    assert out.shape == (N, 1, H, W), out.shape

    ref = _reference_forward(x, params)
    max_err = float(jnp.max(jnp.abs(out - ref)))
    assert jnp.allclose(out, ref, atol=5e-3, rtol=5e-3), max_err

    print("KERNEL_OK")
</pallas_src>

<mosaic_0001>
module attributes {stable_mosaic.version = 11 : i64} {
  func.func @_bn_stats_kernel(%arg0: i32, %arg1: memref<4x512xf32, #tpu.memory_space<vmem>>, %arg2: memref<64x4xf32, #tpu.memory_space<vmem>>, %arg3: memref<64x1xf32, #tpu.memory_space<vmem>>, %arg4: memref<128x64xf32, #tpu.memory_space<vmem>>, %arg5: memref<128x1xf32, #tpu.memory_space<vmem>>, %arg6: memref<128x1xf32, #tpu.memory_space<vmem>>) attributes {dimension_semantics = [#tpu.dimension_semantics<arbitrary>], iteration_bounds = array<i64: 1>, scalar_prefetch = 0 : i64, scratch_operands = 0 : i64, tpu.core_type = #tpu.core_type<tc>, window_params = [{transform_indices = @transform_0, window_bounds = array<i64: 4, 512>}, {pipeline_mode = #tpu.pipeline_mode<synchronous>, transform_indices = @transform_1, window_bounds = array<i64: 64, 4>}, {pipeline_mode = #tpu.pipeline_mode<synchronous>, transform_indices = @transform_2, window_bounds = array<i64: 64, 1>}, {pipeline_mode = #tpu.pipeline_mode<synchronous>, transform_indices = @transform_3, window_bounds = array<i64: 128, 64>}, {pipeline_mode = #tpu.pipeline_mode<synchronous>, transform_indices = @transform_4, window_bounds = array<i64: 128, 1>}, {pipeline_mode = #tpu.pipeline_mode<synchronous>, transform_indices = @transform_5, window_bounds = array<i64: 128, 1>}]} {
    %c0_i32 = arith.constant 0 : i32
    %0 = arith.cmpi eq, %arg0, %c0_i32 : i32
    %1 = arith.extui %0 : i1 to i32
    %c0_i32_0 = arith.constant 0 : i32
    %2 = arith.cmpi ne, %1, %c0_i32_0 : i32
    scf.if %2 {
      %cst_21 = arith.constant 0.000000e+00 : f32
      %31 = vector.broadcast %cst_21 : f32 to vector<128x1xf32>
      %c0_22 = arith.constant 0 : index
      %c0_23 = arith.constant 0 : index
      %32 = vector.load %arg5[%c0_22, %c0_23] : memref<128x1xf32, #tpu.memory_space<vmem>>, vector<128x1xf32>
      tpu.vector_store %arg5[%c0_22, %c0_23], %31 {strides = array<i32>} : memref<128x1xf32, #tpu.memory_space<vmem>>, vector<128x1xf32>,
      %cst_24 = arith.constant 0.000000e+00 : f32
      %33 = vector.broadcast %cst_24 : f32 to vector<128x1xf32>
      %c0_25 = arith.constant 0 : index
      %c0_26 = arith.constant 0 : index
      %34 = vector.load %arg6[%c0_25, %c0_26] : memref<128x1xf32, #tpu.memory_space<vmem>>, vector<128x1xf32>
      tpu.vector_store %arg6[%c0_25, %c0_26], %33 {strides = array<i32>} : memref<128x1xf32, #tpu.memory_space<vmem>>, vector<128x1xf32>,
    } else {
    }
    %c0 = arith.constant 0 : index
    %c0_1 = arith.constant 0 : index
    %3 = vector.load %arg1[%c0, %c0_1] : memref<4x512xf32, #tpu.memory_space<vmem>>, vector<4x512xf32>
    %4 = arith.truncf %3 : vector<4x512xf32> to vector<4x512xbf16>
    %c0_2 = arith.constant 0 : index
    %c0_3 = arith.constant 0 : index
    %5 = vector.load %arg2[%c0_2, %c0_3] : memref<64x4xf32, #tpu.memory_space<vmem>>, vector<64x4xf32>
    %6 = arith.truncf %5 : vector<64x4xf32> to vector<64x4xbf16>
    %cst = arith.constant dense<0.000000e+00> : vector<64x512xf32>
    %7 = tpu.matmul %6, %4, %cst {dimension_numbers = #tpu.dot_dimension_numbers<[1], [0], [0], [1], [0, 0, 1, 1], [], []>} : vector<64x4xbf16>, vector<4x512xbf16>, vector<64x512xf32> -> vector<64x512xf32>
    %c0_4 = arith.constant 0 : index
    %c0_5 = arith.constant 0 : index
    %8 = vector.load %arg3[%c0_4, %c0_5] : memref<64x1xf32, #tpu.memory_space<vmem>>, vector<64x1xf32>
    %9 = vector.broadcast %8 : vector<64x1xf32> to vector<64x512xf32>
    %10 = arith.addf %7, %9 : vector<64x512xf32>
    %cst_6 = arith.constant 0.000000e+00 : f32
    %11 = vector.broadcast %cst_6 : f32 to vector<64x512xf32>
    %12 = arith.cmpf oge, %10, %11 : vector<64x512xf32>
    %cst_7 = arith.constant 2.000000e-01 : f32
    %13 = vector.broadcast %cst_7 : f32 to vector<64x512xf32>
    %14 = arith.mulf %13, %10 : vector<64x512xf32>
    %15 = arith.select %12, %10, %14 : vector<64x512xi1>, vector<64x512xf32>
    %c0_8 = arith.constant 0 : index
    %c0_9 = arith.constant 0 : index
    %16 = vector.load %arg4[%c0_8, %c0_9] : memref<128x64xf32, #tpu.memory_space<vmem>>, vector<128x64xf32>
    %17 = arith.truncf %16 : vector<128x64xf32> to vector<128x64xbf16>
    %18 = arith.truncf %15 : vector<64x512xf32> to vector<64x512xbf16>
    %cst_10 = arith.constant dense<0.000000e+00> : vector<128x512xf32>
    %19 = tpu.matmul %17, %18, %cst_10 {dimension_numbers = #tpu.dot_dimension_numbers<[1], [0], [0], [1], [0, 0, 1, 1], [], []>} : vector<128x64xbf16>, vector<64x512xbf16>, vector<128x512xf32> -> vector<128x512xf32>
    %c0_11 = arith.constant 0 : index
    %c0_12 = arith.constant 0 : index
    %20 = vector.load %arg5[%c0_11, %c0_12] : memref<128x1xf32, #tpu.memory_space<vmem>>, vector<128x1xf32>
    %cst_13 = arith.constant dense<0.000000e+00> : vector<128xf32>
    %21 = vector.multi_reduction <add>, %19, %cst_13 [1] : vector<128x512xf32> to vector<128xf32>
    %22 = vector.shape_cast %21 : vector<128xf32> to vector<128x1xf32>
    %23 = arith.addf %20, %22 : vector<128x1xf32>
    %c0_14 = arith.constant 0 : index
    %c0_15 = arith.constant 0 : index
    %24 = vector.load %arg5[%c0_14, %c0_15] : memref<128x1xf32, #tpu.memory_space<vmem>>, vector<128x1xf32>
    tpu.vector_store %arg5[%c0_14, %c0_15], %23 {strides = array<i32>} : memref<128x1xf32, #tpu.memory_space<vmem>>, vector<128x1xf32>,
    %c0_16 = arith.constant 0 : index
    %c0_17 = arith.constant 0 : index
    %25 = vector.load %arg6[%c0_16, %c0_17] : memref<128x1xf32, #tpu.memory_space<vmem>>, vector<128x1xf32>
    %26 = arith.mulf %19, %19 : vector<128x512xf32>
    %cst_18 = arith.constant dense<0.000000e+00> : vector<128xf32>
    %27 = vector.multi_reduction <add>, %26, %cst_18 [1] : vector<128x512xf32> to vector<128xf32>
    %28 = vector.shape_cast %27 : vector<128xf32> to vector<128x1xf32>
    %29 = arith.addf %25, %28 : vector<128x1xf32>
    %c0_19 = arith.constant 0 : index
    %c0_20 = arith.constant 0 : index
    %30 = vector.load %arg6[%c0_19, %c0_20] : memref<128x1xf32, #tpu.memory_space<vmem>>, vector<128x1xf32>
    tpu.vector_store %arg6[%c0_19, %c0_20], %29 {strides = array<i32>} : memref<128x1xf32, #tpu.memory_space<vmem>>, vector<128x1xf32>,
    return
  }
  func.func @transform_0(%arg0: i32) -> (i32, i32) {
    %c0_i32 = arith.constant 0 : i32
    %c0_i32_0 = arith.constant 0 : i32
    return %c0_i32, %arg0 : i32, i32
  }
  func.func @transform_1(%arg0: i32) -> (i32, i32) {
    %c0_i32 = arith.constant 0 : i32
    %c0_i32_0 = arith.constant 0 : i32
    %c0_i32_1 = arith.constant 0 : i32
    return %c0_i32, %c0_i32_0 : i32, i32
  }
  func.func @transform_2(%arg0: i32) -> (i32, i32) {
    %c0_i32 = arith.constant 0 : i32
    %c0_i32_0 = arith.constant 0 : i32
    %c0_i32_1 = arith.constant 0 : i32
    return %c0_i32, %c0_i32_0 : i32, i32
  }
  func.func @transform_3(%arg0: i32) -> (i32, i32) {
    %c0_i32 = arith.constant 0 : i32
    %c0_i32_0 = arith.constant 0 : i32
    %c0_i32_1 = arith.constant 0 : i32
    return %c0_i32, %c0_i32_0 : i32, i32
  }
  func.func @transform_4(%arg0: i32) -> (i32, i32) {
    %c0_i32 = arith.constant 0 : i32
    %c0_i32_0 = arith.constant 0 : i32
    %c0_i32_1 = arith.constant 0 : i32
    return %c0_i32, %c0_i32_0 : i32, i32
  }
  func.func @transform_5(%arg0: i32) -> (i32, i32) {
    %c0_i32 = arith.constant 0 : i32
    %c0_i32_0 = arith.constant 0 : i32
    %c0_i32_1 = arith.constant 0 : i32
    return %c0_i32, %c0_i32_0 : i32, i32
  }
}

module attributes {stable_mosaic.version = 11 : i64} {
  func.func @_bn_apply_kernel(%arg0: i32, %arg1: memref<4x512xf32, #tpu.memory_space<vmem>>, %arg2: memref<64x4xf32, #tpu.memory_space<vmem>>, %arg3: memref<64x1xf32, #tpu.memory_space<vmem>>, %arg4: memref<128x64xf32, #tpu.memory_space<vmem>>, %arg5: memref<128x1xf32, #tpu.memory_space<vmem>>, %arg6: memref<128x1xf32, #tpu.memory_space<vmem>>, %arg7: memref<1x128xf32, #tpu.memory_space<vmem>>, %arg8: memref<1x512xf32, #tpu.memory_space<vmem>>) attributes {dimension_semantics = [#tpu.dimension_semantics<parallel>], iteration_bounds = array<i64: 1>, scalar_prefetch = 0 : i64, scratch_operands = 0 : i64, tpu.core_type = #tpu.core_type<tc>, window_params = [{transform_indices = @transform_0, window_bounds = array<i64: 4, 512>}, {pipeline_mode = #tpu.pipeline_mode<synchronous>, transform_indices = @transform_1, window_bounds = array<i64: 64, 4>}, {pipeline_mode = #tpu.pipeline_mode<synchronous>, transform_indices = @transform_2, window_bounds = array<i64: 64, 1>}, {pipeline_mode = #tpu.pipeline_mode<synchronous>, transform_indices = @transform_3, window_bounds = array<i64: 128, 64>}, {pipeline_mode = #tpu.pipeline_mode<synchronous>, transform_indices = @transform_4, window_bounds = array<i64: 128, 1>}, {pipeline_mode = #tpu.pipeline_mode<synchronous>, transform_indices = @transform_5, window_bounds = array<i64: 128, 1>}, {pipeline_mode = #tpu.pipeline_mode<synchronous>, transform_indices = @transform_6, window_bounds = array<i64: 1, 128>}, {transform_indices = @transform_7, window_bounds = array<i64: 1, 512>}]} {
    %c0 = arith.constant 0 : index
    %c0_0 = arith.constant 0 : index
    %0 = vector.load %arg1[%c0, %c0_0] : memref<4x512xf32, #tpu.memory_space<vmem>>, vector<4x512xf32>
    %1 = arith.truncf %0 : vector<4x512xf32> to vector<4x512xbf16>
    %c0_1 = arith.constant 0 : index
    %c0_2 = arith.constant 0 : index
    %2 = vector.load %arg2[%c0_1, %c0_2] : memref<64x4xf32, #tpu.memory_space<vmem>>, vector<64x4xf32>
    %3 = arith.truncf %2 : vector<64x4xf32> to vector<64x4xbf16>
    %cst = arith.constant dense<0.000000e+00> : vector<64x512xf32>
    %4 = tpu.matmul %3, %1, %cst {dimension_numbers = #tpu.dot_dimension_numbers<[1], [0], [0], [1], [0, 0, 1, 1], [], []>} : vector<64x4xbf16>, vector<4x512xbf16>, vector<64x512xf32> -> vector<64x512xf32>
    %c0_3 = arith.constant 0 : index
    %c0_4 = arith.constant 0 : index
    %5 = vector.load %arg3[%c0_3, %c0_4] : memref<64x1xf32, #tpu.memory_space<vmem>>, vector<64x1xf32>
    %6 = vector.broadcast %5 : vector<64x1xf32> to vector<64x512xf32>
    %7 = arith.addf %4, %6 : vector<64x512xf32>
    %cst_5 = arith.constant 0.000000e+00 : f32
    %8 = vector.broadcast %cst_5 : f32 to vector<64x512xf32>
    %9 = arith.cmpf oge, %7, %8 : vector<64x512xf32>
    %cst_6 = arith.constant 2.000000e-01 : f32
    %10 = vector.broadcast %cst_6 : f32 to vector<64x512xf32>
    %11 = arith.mulf %10, %7 : vector<64x512xf32>
    %12 = arith.select %9, %7, %11 : vector<64x512xi1>, vector<64x512xf32>
    %c0_7 = arith.constant 0 : index
    %c0_8 = arith.constant 0 : index
    %13 = vector.load %arg4[%c0_7, %c0_8] : memref<128x64xf32, #tpu.memory_space<vmem>>, vector<128x64xf32>
    %14 = arith.truncf %13 : vector<128x64xf32> to vector<128x64xbf16>
    %15 = arith.truncf %12 : vector<64x512xf32> to vector<64x512xbf16>
    %cst_9 = arith.constant dense<0.000000e+00> : vector<128x512xf32>
    %16 = tpu.matmul %14, %15, %cst_9 {dimension_numbers = #tpu.dot_dimension_numbers<[1], [0], [0], [1], [0, 0, 1, 1], [], []>} : vector<128x64xbf16>, vector<64x512xbf16>, vector<128x512xf32> -> vector<128x512xf32>
    %c0_10 = arith.constant 0 : index
    %c0_11 = arith.constant 0 : index
    %17 = vector.load %arg5[%c0_10, %c0_11] : memref<128x1xf32, #tpu.memory_space<vmem>>, vector<128x1xf32>
    %18 = vector.broadcast %17 : vector<128x1xf32> to vector<128x512xf32>
    %19 = arith.mulf %16, %18 : vector<128x512xf32>
    %c0_12 = arith.constant 0 : index
    %c0_13 = arith.constant 0 : index
    %20 = vector.load %arg6[%c0_12, %c0_13] : memref<128x1xf32, #tpu.memory_space<vmem>>, vector<128x1xf32>
    %21 = vector.broadcast %20 : vector<128x1xf32> to vector<128x512xf32>
    %22 = arith.addf %19, %21 : vector<128x512xf32>
    %cst_14 = arith.constant 0.000000e+00 : f32
    %23 = vector.broadcast %cst_14 : f32 to vector<128x512xf32>
    %24 = arith.cmpf oge, %22, %23 : vector<128x512xf32>
    %cst_15 = arith.constant 2.000000e-01 : f32
    %25 = vector.broadcast %cst_15 : f32 to vector<128x512xf32>
    %26 = arith.mulf %25, %22 : vector<128x512xf32>
    %27 = arith.select %24, %22, %26 : vector<128x512xi1>, vector<128x512xf32>
    %c0_16 = arith.constant 0 : index
    %c0_17 = arith.constant 0 : index
    %28 = vector.load %arg7[%c0_16, %c0_17] : memref<1x128xf32, #tpu.memory_space<vmem>>, vector<1x128xf32>
    %29 = arith.truncf %28 : vector<1x128xf32> to vector<1x128xbf16>
    %30 = arith.truncf %27 : vector<128x512xf32> to vector<128x512xbf16>
    %cst_18 = arith.constant dense<0.000000e+00> : vector<1x512xf32>
    %31 = tpu.matmul %29, %30, %cst_18 {dimension_numbers = #tpu.dot_dimension_numbers<[1], [0], [0], [1], [0, 0, 1, 1], [], []>} : vector<1x128xbf16>, vector<128x512xbf16>, vector<1x512xf32> -> vector<1x512xf32>
    %c0_19 = arith.constant 0 : index
    %c0_20 = arith.constant 0 : index
    %32 = vector.load %arg8[%c0_19, %c0_20] : memref<1x512xf32, #tpu.memory_space<vmem>>, vector<1x512xf32>
    tpu.vector_store %arg8[%c0_19, %c0_20], %31 {strides = array<i32>} : memref<1x512xf32, #tpu.memory_space<vmem>>, vector<1x512xf32>,
    return
  }
  func.func @transform_0(%arg0: i32) -> (i32, i32) {
    %c0_i32 = arith.constant 0 : i32
    %c0_i32_0 = arith.constant 0 : i32
    return %c0_i32, %arg0 : i32, i32
  }
  func.func @transform_1(%arg0: i32) -> (i32, i32) {
    %c0_i32 = arith.constant 0 : i32
    %c0_i32_0 = arith.constant 0 : i32
    %c0_i32_1 = arith.constant 0 : i32
    return %c0_i32, %c0_i32_0 : i32, i32
  }
  func.func @transform_2(%arg0: i32) -> (i32, i32) {
    %c0_i32 = arith.constant 0 : i32
    %c0_i32_0 = arith.constant 0 : i32
    %c0_i32_1 = arith.constant 0 : i32
    return %c0_i32, %c0_i32_0 : i32, i32
  }
  func.func @transform_3(%arg0: i32) -> (i32, i32) {
    %c0_i32 = arith.constant 0 : i32
    %c0_i32_0 = arith.constant 0 : i32
    %c0_i32_1 = arith.constant 0 : i32
    return %c0_i32, %c0_i32_0 : i32, i32
  }
  func.func @transform_4(%arg0: i32) -> (i32, i32) {
    %c0_i32 = arith.constant 0 : i32
    %c0_i32_0 = arith.constant 0 : i32
    %c0_i32_1 = arith.constant 0 : i32
    return %c0_i32, %c0_i32_0 : i32, i32
  }
  func.func @transform_5(%arg0: i32) -> (i32, i32) {
    %c0_i32 = arith.constant 0 : i32
    %c0_i32_0 = arith.constant 0 : i32
    %c0_i32_1 = arith.constant 0 : i32
    return %c0_i32, %c0_i32_0 : i32, i32
  }
  func.func @transform_6(%arg0: i32) -> (i32, i32) {
    %c0_i32 = arith.constant 0 : i32
    %c0_i32_0 = arith.constant 0 : i32
    %c0_i32_1 = arith.constant 0 : i32
    return %c0_i32, %c0_i32_0 : i32, i32
  }
  func.func @transform_7(%arg0: i32) -> (i32, i32) {
    %c0_i32 = arith.constant 0 : i32
    %c0_i32_0 = arith.constant 0 : i32
    return %c0_i32, %arg0 : i32, i32
  }
}

</mosaic_0001>

<bundles_post_ra>
// kernel: pixel_discriminator_forward.3
= control target key start
LH: loop header
LB: loop body
LE: loop exit
PB: predicated region body
PF: predicated region fallthrough
CT: control target
= control target key end

     0   :  { %vm112_vm0 = vcmask 1041408   ;;  %v1356_v2 = vmov 0   ;;  %vm99_vm1 = vcmask 31744   ;;  %s2124_s0 = inlined_call_operand.vmem [shape: f32[4,512], index: 0, kind: input, shape index: {}]   ;;  %s2125_s1 = inlined_call_operand.vmem [shape: f32[64,4], index: 1, kind: input, shape index: {}]   ;;  %s2126_s2 = inlined_call_operand.vmem [shape: f32[64,1], index: 2, kind: input, shape index: {}]   ;;  %s2127_s4 = inlined_call_operand.vmem [shape: f32[128,1], index: 4, kind: input, shape index: {}]   ;;  %s2128_s5 = inlined_call_operand.vmem [shape: f32[128,1], index: 5, kind: input, shape index: {}]   ;;  %s2129_s3 = inlined_call_operand.vmem [shape: f32[128,64], index: 3, kind: input, shape index: {}]   ;;  %s2130_s6 = inlined_call_operand.vmem [shape: f32[1,128], index: 6, kind: input, shape index: {}]   ;;  %s2131_s7 = inlined_call_operand.vmem [shape: f32[1,512], index: 7, kind: output, shape index: {}]  }
   0x1   :  { %v27_v0 = vld [vmem:[%s2124_s0] sm:$0xff]  ;;  %v28_v1 = vld [vmem:[%s2124_s0 + $0x8] sm:$0xff]  ;;  %157 = vmatprep.mubr.bf16.mxu0 %v1356_v2  ;;  %230 = vmatprep.mubr.bf16.mxu1 %v1356_v2  ;;  %v53_v10 = vld [vmem:[%s2126_s2 + $0x10] sm:$0xff] }
   0x2   :  { %v31_v3 = vcombine.high %v27_v0, %v27_v0  ;;  %v32_v4 = vcombine.high %v28_v1, %v28_v1  ;;  %v35_v5 = vpack.c.bf16 %v27_v0, %v27_v0  ;;  %v37_v6 = vpack.c.bf16 %v28_v1, %v28_v1  ;;  %1352 = vset.pattern.permute.xlu0 %v1356_v2  ;;  %v51_v7 = vld [vmem:[%s2126_s2] sm:$0xff]  ;;  %v40_v9 = vld [vmem:[%s2125_s1 + $0x8] sm:$0xff]  ;;  %v54_v16 = vld [vmem:[%s2126_s2 + $0x18] sm:$0xff] }
   0x3   :  { %v39_v8 = vld [vmem:[%s2125_s1] sm:$0xff]  ;;  %61 = vperm.xlu0 %1352, %v51_v7   ;;  %1353 = vset.pattern.permute.xlu1 %v1356_v2  ;;  %v52_v15 = vld [vmem:[%s2126_s2 + $0x8] sm:$0xff]  ;;  %v41_v20 = vld [vmem:[%s2125_s1 + $0x10] sm:$0xff] }
   0x4   :  { %v36_v11 = vpack.c.bf16 %v31_v3, %v31_v3  ;;  %v38_v12 = vpack.c.bf16 %v32_v4, %v32_v4  ;;  %v114_v13 = vsel %vm112_vm0, %v35_v5, 0  ;;  %v120_v14 = vsel %vm112_vm0, %v37_v6, 0  ;;  %71 = vperm.xlu1 %1353, %v53_v10   ;;  %v55_v18 = vld [vmem:[%s2126_s2 + $0x20] sm:$0xff]  ;;  %v56_v19 = vld [vmem:[%s2126_s2 + $0x28] sm:$0xff]  ;;  %v42_v21 = vld [vmem:[%s2125_s1 + $0x18] sm:$0xff] }
   0x5   :  { %v47_v17 = vpack.c.bf16 %v40_v9, %v39_v8  ;;  %v57_v22 = vld [vmem:[%s2126_s2 + $0x30] sm:$0xff]  ;;  %v58_v23 = vld [vmem:[%s2126_s2 + $0x38] sm:$0xff]  ;;  %v48_v24 = vpack.c.bf16 %v42_v21, %v41_v20  ;;  %v658_v25 = vld [vmem:[%s2127_s4] sm:$0xff] }
   0x6   :  { %1324 = vmatprep.subr.msk.bf16.mxu0 %vm112_vm0, %v36_v11  ;;  %1329 = vmatprep.subr.msk.bf16.mxu1 %vm112_vm0, %v38_v12  ;;  %v659_v26 = vld [vmem:[%s2127_s4 + $0x8] sm:$0xff]  ;;  %v43_v27 = vld [vmem:[%s2125_s1 + $0x20] sm:$0xff]  ;;  %v660_v32 = vld [vmem:[%s2127_s4 + $0x10] sm:$0xff] }
   0x7   :  { %126 = vmatpush1.bf16.msra.mxu0 %v114_v13  ;;  %199 = vmatpush1.bf16.msra.mxu1 %v120_v14  ;;  %v44_v28 = vld [vmem:[%s2125_s1 + $0x28] sm:$0xff]  ;;  %v818_v29 = vld [vmem:[%s2128_s5] sm:$0xff]  ;;  %v661_v33 = vld [vmem:[%s2127_s4 + $0x18] sm:$0xff] }
   0x8   :  { %66 = vperm.xlu0 %1352, %v52_v15   ;;  %76 = vperm.xlu1 %1353, %v54_v16   ;;  %v819_v30 = vld [vmem:[%s2128_s5 + $0x8] sm:$0xff]  ;;  %v49_v31 = vpack.c.bf16 %v44_v28, %v43_v27  ;;  %v45_v34 = vld [vmem:[%s2125_s1 + $0x30] sm:$0xff]  ;;  %v46_v35 = vld [vmem:[%s2125_s1 + $0x38] sm:$0xff] }
   0x9   :  { %v820_v36 = vld [vmem:[%s2128_s5 + $0x10] sm:$0xff]  ;;  %v821_v37 = vld [vmem:[%s2128_s5 + $0x18] sm:$0xff]  ;;  %v50_v38 = vpack.c.bf16 %v46_v35, %v45_v34  ;;  %v662_v39 = vld [vmem:[%s2127_s4 + $0x20] sm:$0xff] }
   0xa   :  { %1325 = vmatmul.mubr.msk.bf16.vlgmr.msra.gmra.mrb[0].mxu0 %vm99_vm1, %v47_v17  ;;  %1330 = vmatmul.mubr.msk.bf16.vlgmr.msra.gmra.mrb[0].mxu1 %vm99_vm1, %v47_v17  ;;  %v663_v40 = vld [vmem:[%s2127_s4 + $0x28] sm:$0xff]  ;;  %v822_v41 = vld [vmem:[%s2128_s5 + $0x20] sm:$0xff]  ;;  %v664_v43 = vld [vmem:[%s2127_s4 + $0x30] sm:$0xff] }
   0xb   :  { %167 = vmatprep.mubr.bf16.mxu0 %v1356_v2  ;;  %240 = vmatprep.mubr.bf16.mxu1 %v1356_v2  ;;  %v823_v42 = vld [vmem:[%s2128_s5 + $0x28] sm:$0xff]  ;;  %v665_v44 = vld [vmem:[%s2127_s4 + $0x38] sm:$0xff]  ;;  %v824_v45 = vld [vmem:[%s2128_s5 + $0x30] sm:$0xff] }
   0xc   :  { %81 = vperm.xlu0 %1352, %v55_v18   ;;  %86 = vperm.xlu1 %1353, %v56_v19   ;;  %v825_v46 = vld [vmem:[%s2128_s5 + $0x38] sm:$0xff]  ;;  %v666_v47 = vld [vmem:[%s2127_s4 + $0x40] sm:$0xff]  ;;  %v667_v48 = vld [vmem:[%s2127_s4 + $0x48] sm:$0xff] }
   0xd   :  { %v826_v49 = vld [vmem:[%s2128_s5 + $0x40] sm:$0xff]  ;;  %v827_v50 = vld [vmem:[%s2128_s5 + $0x48] sm:$0xff]  ;;  %v668_v51 = vld [vmem:[%s2127_s4 + $0x50] sm:$0xff] }
   0xe   :  { %v669_v52 = vld [vmem:[%s2127_s4 + $0x58] sm:$0xff]  ;;  %v828_v53 = vld [vmem:[%s2128_s5 + $0x50] sm:$0xff]  ;;  %v670_v55 = vld [vmem:[%s2127_s4 + $0x60] sm:$0xff] }
   0xf   :  { %v829_v54 = vld [vmem:[%s2128_s5 + $0x58] sm:$0xff]  ;;  %v671_v56 = vld [vmem:[%s2127_s4 + $0x68] sm:$0xff]  ;;  %v830_v57 = vld [vmem:[%s2128_s5 + $0x60] sm:$0xff] }
  0x10   :  { %91 = vperm.xlu0 %1352, %v57_v22   ;;  %96 = vperm.xlu1 %1353, %v58_v23   ;;  %v831_v58 = vld [vmem:[%s2128_s5 + $0x68] sm:$0xff]  ;;  %v672_v59 = vld [vmem:[%s2127_s4 + $0x70] sm:$0xff]  ;;  %v673_v60 = vld [vmem:[%s2127_s4 + $0x78] sm:$0xff] }
  0x11   :  { %v832_v61 = vld [vmem:[%s2128_s5 + $0x70] sm:$0xff]  ;;  %v833_v62 = vld [vmem:[%s2128_s5 + $0x78] sm:$0xff] }
  0x12   :  { %1326 = vmatmul.mubr.msk.bf16.gmra.mrb[4].mxu0 %vm99_vm1, %v48_v24  ;;  %1331 = vmatmul.mubr.msk.bf16.gmra.mrb[4].mxu1 %vm99_vm1, %v48_v24 }
  0x13   :  { %177 = vmatprep.mubr.bf16.mxu0 %v1356_v2  ;;  %250 = vmatprep.mubr.bf16.mxu1 %v1356_v2 }
  0x14   :  { %676 = vperm.xlu0 %1352, %v658_v25   ;;  %681 = vperm.xlu1 %1353, %v659_v26  }
  0x18   :  { %836 = vperm.xlu0 %1352, %v818_v29   ;;  %841 = vperm.xlu1 %1353, %v819_v30  }
  0x1a   :  { %1327 = vmatmul.mubr.msk.bf16.gmra.mrb[8].mxu0 %vm99_vm1, %v49_v31  ;;  %1332 = vmatmul.mubr.msk.bf16.gmra.mrb[8].mxu1 %vm99_vm1, %v49_v31 }
  0x1b   :  { %187 = vmatprep.mubr.bf16.mxu0 %v1356_v2  ;;  %260 = vmatprep.mubr.bf16.mxu1 %v1356_v2 }
  0x1c   :  { %686 = vperm.xlu0 %1352, %v660_v32   ;;  %691 = vperm.xlu1 %1353, %v661_v33  }
  0x20   :  { %846 = vperm.xlu0 %1352, %v820_v36   ;;  %851 = vperm.xlu1 %1353, %v821_v37  }
  0x22   :  { %1328 = vmatmul.mubr.msk.bf16.gmra.mrb[12].mxu0 %vm99_vm1, %v50_v38  ;;  %1333 = vmatmul.mubr.msk.bf16.gmra.mrb[12].mxu1 %vm99_vm1, %v50_v38 }
  0x23   :  { %464 = vmatprep.mubr.bf16.mxu0 %v1356_v2  ;;  %577 = vmatprep.mubr.bf16.mxu1 %v1356_v2 }
  0x24   :  { %696 = vperm.xlu0 %1352, %v662_v39   ;;  %701 = vperm.xlu1 %1353, %v663_v40  }
  0x28   :  { %856 = vperm.xlu0 %1352, %v822_v41   ;;  %861 = vperm.xlu1 %1353, %v823_v42  }
  0x2c   :  { %706 = vperm.xlu0 %1352, %v664_v43   ;;  %711 = vperm.xlu1 %1353, %v665_v44  }
  0x30   :  { %866 = vperm.xlu0 %1352, %v824_v45   ;;  %871 = vperm.xlu1 %1353, %v825_v46  }
  0x34   :  { %716 = vperm.xlu0 %1352, %v666_v47   ;;  %721 = vperm.xlu1 %1353, %v667_v48  }
  0x38   :  { %876 = vperm.xlu0 %1352, %v826_v49   ;;  %881 = vperm.xlu1 %1353, %v827_v50  }
  0x3c   :  { %726 = vperm.xlu0 %1352, %v668_v51   ;;  %731 = vperm.xlu1 %1353, %v669_v52  }
  0x40   :  { %886 = vperm.xlu0 %1352, %v828_v53   ;;  %891 = vperm.xlu1 %1353, %v829_v54  }
  0x44   :  { %736 = vperm.xlu0 %1352, %v670_v55   ;;  %741 = vperm.xlu1 %1353, %v671_v56  }
  0x48   :  { %896 = vperm.xlu0 %1352, %v830_v57   ;;  %901 = vperm.xlu1 %1353, %v831_v58  }
  0x4c   :  { %746 = vperm.xlu0 %1352, %v672_v59   ;;  %751 = vperm.xlu1 %1353, %v673_v60  }
  0x50   :  { %906 = vperm.xlu0 %1352, %v832_v61   ;;  %911 = vperm.xlu1 %1353, %v833_v62  }
  0x82   :  { %v62_v63 = vpop.permute.xlu0 %61 }
  0x83   :  { %v72_v0 = vpop.permute.xlu1 %71 }
  0x87   :  { %v67_v12 = vpop.permute.xlu0 %66  ;;  %v77_v25 = vpop.permute.xlu1 %76 }
  0x8b   :  { %v82_v61 = vpop.permute.xlu0 %81  ;;  %v87_v62 = vpop.permute.xlu1 %86 }
  0xdd   :  { %v159_v1 = vpop.f32.mrb[0].mxu0  ;;  %v232_v3 = vpop.f32.mrb[0].mxu1 }
  0xde   :  { %v160_v4 = vadd.f32 %v159_v1, %v62_v63  ;;  %v233_v5 = vadd.f32 %v232_v3, %v62_v63  ;;  %v161_v6 = vpop.f32.mrb[1].mxu0  ;;  %v234_v7 = vpop.f32.mrb[1].mxu1 }
  0xdf   :  { %v162_v8 = vadd.f32 %v161_v6, %v62_v63  ;;  %v235_v9 = vadd.f32 %v234_v7, %v62_v63  ;;  %v163_v10 = vpop.f32.mrb[2].mxu0  ;;  %v236_v11 = vpop.f32.mrb[2].mxu1 }
  0xe0   :  { %vm271_vm2 = vcmp.ge.f32.partialorder %v160_v4, 0.0  ;;  %v303_v13 = vmul.f32 0.2, %v160_v4  ;;  %vm273_vm3 = vcmp.ge.f32.partialorder %v233_v5, 0.0  ;;  %v305_v14 = vmul.f32 0.2, %v233_v5 }
  0xe1   :  { %vm272_vm4 = vcmp.ge.f32.partialorder %v162_v8, 0.0  ;;  %v304_v15 = vmul.f32 0.2, %v162_v8  ;;  %v164_v16 = vadd.f32 %v163_v10, %v67_v12  ;;  %v237_v17 = vadd.f32 %v236_v11, %v67_v12  ;;  %v165_v18 = vpop.f32.mrb[3].mxu0  ;;  %v238_v19 = vpop.f32.mrb[3].mxu1 }
  0xe2   :  { %vm274_vm5 = vcmp.ge.f32.partialorder %v235_v9, 0.0  ;;  %v306_v20 = vmul.f32 0.2, %v235_v9  ;;  %v166_v21 = vadd.f32 %v165_v18, %v67_v12  ;;  %v239_v22 = vadd.f32 %v238_v19, %v67_v12 }
  0xe3   :  { %vm275_vm6 = vcmp.ge.f32.partialorder %v164_v16, 0.0  ;;  %v307_v23 = vmul.f32 0.2, %v164_v16  ;;  %vm277_vm7 = vcmp.ge.f32.partialorder %v237_v17, 0.0  ;;  %v309_v24 = vmul.f32 0.2, %v237_v17 }
  0xe4   :  { %v335_v26 = vsel %vm271_vm2, %v160_v4, %v303_v13  ;;  %v337_v27 = vsel %vm273_vm3, %v233_v5, %v305_v14  ;;  %v308_v28 = vmul.f32 0.2, %v166_v21  ;;  %v310_v29 = vmul.f32 0.2, %v239_v22 }
  0xe5   :  { %v339_v30 = vsel %vm275_vm6, %v164_v16, %v307_v23  ;;  %v341_v31 = vsel %vm277_vm7, %v237_v17, %v309_v24  ;;  %vm276_vm8 = vcmp.ge.f32.partialorder %v166_v21, 0.0  ;;  %vm278_vm9 = vcmp.ge.f32.partialorder %v239_v22, 0.0  ;;  %v169_v32 = vpop.f32.mrb[4].mxu0  ;;  %v242_v33 = vpop.f32.mrb[4].mxu1 }
  0xe6   :  { %v391_v34 = vpack.c.bf16 %v339_v30, %v335_v26  ;;  %v393_v35 = vpack.c.bf16 %v341_v31, %v337_v27  ;;  %v170_v36 = vadd.f32 %v169_v32, %v72_v0  ;;  %v243_v37 = vadd.f32 %v242_v33, %v72_v0  ;;  %v171_v38 = vpop.f32.mrb[5].mxu0  ;;  %v244_v39 = vpop.f32.mrb[5].mxu1 }
  0xe7   :  { %v172_v40 = vadd.f32 %v171_v38, %v72_v0  ;;  %v245_v41 = vadd.f32 %v244_v39, %v72_v0  ;;  %v173_v42 = vpop.f32.mrb[6].mxu0  ;;  %v246_v43 = vpop.f32.mrb[6].mxu1  ;;  %v336_v44 = vsel %vm272_vm4, %v162_v8, %v304_v15  ;;  %v340_v45 = vsel %vm276_vm8, %v166_v21, %v308_v28 }
  0xe8   :  { %vm279_vm10 = vcmp.ge.f32.partialorder %v170_v36, 0.0  ;;  %v338_v46 = vsel %vm274_vm5, %v235_v9, %v306_v20  ;;  %v342_v47 = vsel %vm278_vm9, %v239_v22, %v310_v29  ;;  %v311_v48 = vmul.f32 0.2, %v170_v36  ;;  %v175_v53 = vpop.f32.mrb[7].mxu0  ;;  %v248_v54 = vpop.f32.mrb[7].mxu1 }
  0xe9   :  { %vm281_vm11 = vcmp.ge.f32.partialorder %v243_v37, 0.0  ;;  %v313_v49 = vmul.f32 0.2, %v243_v37  ;;  %vm280_vm12 = vcmp.ge.f32.partialorder %v172_v40, 0.0  ;;  %v312_v50 = vmul.f32 0.2, %v172_v40  ;;  %v92_v39 = vpop.permute.xlu0 %91 }
  0xea   :  { %vm282_vm13 = vcmp.ge.f32.partialorder %v245_v41, 0.0  ;;  %v174_v51 = vadd.f32 %v173_v42, %v77_v25  ;;  %v247_v52 = vadd.f32 %v246_v43, %v77_v25  ;;  %v176_v55 = vadd.f32 %v175_v53, %v77_v25 }
  0xeb   :  { %v249_v56 = vadd.f32 %v248_v54, %v77_v25  ;;  %v392_v57 = vpack.c.bf16 %v340_v45, %v336_v44  ;;  %v394_v58 = vpack.c.bf16 %v342_v47, %v338_v46  ;;  %v343_v63 = vsel %vm279_vm10, %v170_v36, %v311_v48 }
  0xec   :  { %vm283_vm14 = vcmp.ge.f32.partialorder %v174_v51, 0.0  ;;  %v315_v59 = vmul.f32 0.2, %v174_v51  ;;  %vm285_vm15 = vcmp.ge.f32.partialorder %v247_v52, 0.0  ;;  %v317_v60 = vmul.f32 0.2, %v247_v52 }
  0xed   :  { %v1580_v0 = vsel %vm281_vm11, %v243_v37, %v313_v49  ;;  %v314_v1 = vmul.f32 0.2, %v245_v41  ;;  %v316_v3 = vmul.f32 0.2, %v176_v55  ;;  %432 = vmatprep.subr.bf16.mxu0 %v392_v57  ;;  %545 = vmatprep.subr.bf16.mxu1 %v394_v58  ;;  %vm284_vm0 = vcmp.ge.f32.partialorder %v176_v55, 0.0  ;;  %v179_v6 = vpop.f32.mrb[8].mxu0 }
  0xee   :  { %v347_v4 = vsel %vm283_vm14, %v174_v51, %v315_v59  ;;  %v1582_v5 = vsel %vm285_vm15, %v247_v52, %v317_v60  ;;  %vm286_vm1 = vcmp.ge.f32.partialorder %v249_v56, 0.0  ;;  %433 = vmatpush1.bf16.msra.mxu0 %v391_v34  ;;  %546 = vmatpush1.bf16.msra.mxu1 %v393_v35  ;;  %v252_v7 = vpop.f32.mrb[8].mxu1  ;;  %v180_v10 = vadd.f32 %v179_v6, %v82_v61  ;;  %v181_v12 = vpop.f32.mrb[9].mxu0 }
  0xef   :  { %v395_v8 = vpack.c.bf16 %v347_v4, %v343_v63  ;;  %v397_v9 = vpack.c.bf16 %v1582_v5, %v1580_v0  ;;  %v253_v11 = vadd.f32 %v252_v7, %v82_v61  ;;  %v254_v13 = vpop.f32.mrb[9].mxu1  ;;  %v318_v14 = vmul.f32 0.2, %v249_v56  ;;  %v183_v17 = vpop.f32.mrb[10].mxu0 }
  0xf0   :  { %v1586_v15 = vadd.f32 %v181_v12, %v82_v61  ;;  %v1588_v16 = vadd.f32 %v254_v13, %v82_v61  ;;  %v256_v18 = vpop.f32.mrb[10].mxu1  ;;  %v344_v19 = vsel %vm280_vm12, %v172_v40, %v312_v50  ;;  %vm287_vm2 = vcmp.ge.f32.partialorder %v180_v10, 0.0  ;;  %v185_v29 = vpop.f32.mrb[11].mxu0 }
  0xf1   :  { %v319_v20 = vmul.f32 0.2, %v180_v10  ;;  %v348_v21 = vsel %vm284_vm0, %v176_v55, %v316_v3  ;;  %v346_v22 = vsel %vm282_vm13, %v245_v41, %v314_v1  ;;  %vm289_vm3 = vcmp.ge.f32.partialorder %v253_v11, 0.0  ;;  %v258_v30 = vpop.f32.mrb[11].mxu1  ;;  %v97_v40 = vpop.permute.xlu1 %96 }
  0xf2   :  { %v321_v23 = vmul.f32 0.2, %v253_v11  ;;  %vm288_vm4 = vcmp.ge.f32.partialorder %v1586_v15, 0.0  ;;  %v320_v24 = vmul.f32 0.2, %v1586_v15  ;;  %v184_v27 = vadd.f32 %v183_v17, %v87_v62 }
  0xf3   :  { %v1595_v25 = vsel %vm287_vm2, %v180_v10, %v319_v20  ;;  %v1598_v26 = vmul.f32 0.2, %v1588_v16  ;;  %v257_v28 = vadd.f32 %v256_v18, %v87_v62  ;;  %v186_v31 = vadd.f32 %v185_v29, %v87_v62  ;;  %v369_v29 = vld [vmem:[%s2129_s3 + $0x10] sm:$0xff] }
  0xf4   :  { %v1600_v32 = vadd.f32 %v258_v30, %v87_v62  ;;  %v396_v33 = vpack.c.bf16 %v348_v21, %v344_v19  ;;  %v350_v34 = vsel %vm286_vm1, %v249_v56, %v318_v14  ;;  %vm290_vm5 = vcmp.ge.f32.partialorder %v1588_v16, 0.0  ;;  %v370_v30 = vld [vmem:[%s2129_s3 + $0x18] sm:$0xff] }
  0xf5   :  { %v189_v35 = vpop.f32.mrb[12].mxu0  ;;  %v262_v36 = vpop.f32.mrb[12].mxu1  ;;  %vm291_vm6 = vcmp.ge.f32.partialorder %v184_v27, 0.0  ;;  %v323_v37 = vmul.f32 0.2, %v184_v27  ;;  %vm293_vm7 = vcmp.ge.f32.partialorder %v257_v28, 0.0  ;;  %v1605_v41 = vsel %vm289_vm3, %v253_v11, %v321_v23 }
  0xf6   :  { %v325_v38 = vmul.f32 0.2, %v257_v28  ;;  %vm292_vm8 = vcmp.ge.f32.partialorder %v186_v31, 0.0  ;;  %v324_v42 = vmul.f32 0.2, %v186_v31  ;;  %vm294_vm9 = vcmp.ge.f32.partialorder %v1600_v32, 0.0  ;;  %434 = vmatprep.subr.bf16.mxu0 %v396_v33 }
  0xf7   :  { %v355_v43 = vsel %vm291_vm6, %v184_v27, %v323_v37  ;;  %v398_v45 = vpack.c.bf16 %v350_v34, %v346_v22  ;;  %435 = vmatpush1.bf16.msra.mxu0 %v395_v8  ;;  %v190_v46 = vadd.f32 %v189_v35, %v92_v39  ;;  %v191_v47 = vpop.f32.mrb[13].mxu0  ;;  %v264_v48 = vpop.f32.mrb[13].mxu1  ;;  %v263_v51 = vadd.f32 %v262_v36, %v92_v39  ;;  %v372_v33 = vld [vmem:[%s2129_s3 + $0x28] sm:$0xff]  ;;  %v373_v35 = vld [vmem:[%s2129_s3 + $0x30] sm:$0xff]  ;;  %v374_v36 = vld [vmem:[%s2129_s3 + $0x38] sm:$0xff] }
  0xf8   :  { %v357_v44 = vsel %vm293_vm7, %v257_v28, %v325_v38  ;;  %v399_v49 = vpack.c.bf16 %v355_v43, %v1595_v25  ;;  %v192_v52 = vadd.f32 %v191_v47, %v92_v39  ;;  %v193_v53 = vpop.f32.mrb[14].mxu0  ;;  %v266_v54 = vpop.f32.mrb[14].mxu1  ;;  %v265_v56 = vadd.f32 %v264_v48, %v92_v39  ;;  %v375_v38 = vld [vmem:[%s2129_s3 + $0x40] sm:$0xff]  ;;  %v376_v39 = vld [vmem:[%s2129_s3 + $0x48] sm:$0xff]  ;;  %v381_v47 = vld [vmem:[%s2129_s3 + $0x70] sm:$0xff] }
  0xf9   :  { %v401_v50 = vpack.c.bf16 %v357_v44, %v1605_v41  ;;  %547 = vmatprep.subr.bf16.mxu1 %v398_v45  ;;  %vm295_vm10 = vcmp.ge.f32.partialorder %v190_v46, 0.0  ;;  %v327_v55 = vmul.f32 0.2, %v190_v46  ;;  %v194_v57 = vadd.f32 %v193_v53, %v97_v40  ;;  %v195_v58 = vpop.f32.mrb[15].mxu0  ;;  %v268_v59 = vpop.f32.mrb[15].mxu1  ;;  %v377_v41 = vld [vmem:[%s2129_s3 + $0x50] sm:$0xff] }
  0xfa   :  { %v326_v60 = vmul.f32 0.2, %v1600_v32  ;;  %548 = vmatpush1.bf16.msra.mxu1 %v397_v9  ;;  %vm297_vm11 = vcmp.ge.f32.partialorder %v263_v51, 0.0  ;;  %v329_v61 = vmul.f32 0.2, %v263_v51  ;;  %vm296_vm12 = vcmp.ge.f32.partialorder %v192_v52, 0.0 }
  0xfb   :  { %v359_v62 = vsel %vm295_vm10, %v190_v46, %v327_v55  ;;  %v328_v63 = vmul.f32 0.2, %v192_v52  ;;  %vm298_vm13 = vcmp.ge.f32.partialorder %v265_v56, 0.0  ;;  %vm299_vm14 = vcmp.ge.f32.partialorder %v194_v57, 0.0  ;;  %v379_v44 = vld [vmem:[%s2129_s3 + $0x60] sm:$0xff]  ;;  %v380_v45 = vld [vmem:[%s2129_s3 + $0x68] sm:$0xff] }
  0xfc   :  { %v330_v1 = vmul.f32 0.2, %v265_v56  ;;  %v331_v3 = vmul.f32 0.2, %v194_v57  ;;  %v267_v4 = vadd.f32 %v266_v54, %v97_v40  ;;  %v196_v6 = vadd.f32 %v195_v58, %v97_v40  ;;  %v382_v48 = vld [vmem:[%s2129_s3 + $0x78] sm:$0xff] }
  0xfd   :  { %v361_v7 = vsel %vm297_vm11, %v263_v51, %v329_v61  ;;  %v269_v8 = vadd.f32 %v268_v59, %v97_v40  ;;  %v352_v10 = vsel %vm288_vm4, %v1586_v15, %v320_v24  ;;  %v356_v0 = vsel %vm292_vm8, %v186_v31, %v324_v42  ;;  %v378_v42 = vld [vmem:[%s2129_s3 + $0x58] sm:$0xff]  ;;  %v682_v51 = vpop.permute.xlu1 %681 }
  0xfe   :  { %v363_v5 = vsel %vm299_vm14, %v194_v57, %v331_v3  ;;  %vm301_vm15 = vcmp.ge.f32.partialorder %v267_v4, 0.0  ;;  %v333_v9 = vmul.f32 0.2, %v267_v4  ;;  %vm300_vm0 = vcmp.ge.f32.partialorder %v196_v6, 0.0 }
  0xff   :  { %v403_v11 = vpack.c.bf16 %v363_v5, %v359_v62  ;;  %v332_v12 = vmul.f32 0.2, %v196_v6  ;;  %vm302_vm1 = vcmp.ge.f32.partialorder %v269_v8, 0.0  ;;  %v334_v13 = vmul.f32 0.2, %v269_v8 }
 0x100   :  { %v365_v14 = vsel %vm301_vm15, %v267_v4, %v333_v9  ;;  %v400_v17 = vpack.c.bf16 %v356_v0, %v352_v10  ;;  %v354_v18 = vsel %vm290_vm5, %v1588_v16, %v1598_v26  ;;  %v358_v15 = vsel %vm294_vm9, %v1600_v32, %v326_v60  ;;  %v367_v16 = vld [vmem:[%s2129_s3] sm:$0xff]  ;;  %v368_v26 = vld [vmem:[%s2129_s3 + $0x8] sm:$0xff] }
 0x101   :  { %v405_v19 = vpack.c.bf16 %v365_v14, %v361_v7  ;;  %v402_v20 = vpack.c.bf16 %v358_v15, %v354_v18  ;;  %v360_v21 = vsel %vm296_vm12, %v192_v52, %v328_v63  ;;  %v364_v22 = vsel %vm300_vm0, %v196_v6, %v332_v12  ;;  %v371_v32 = vld [vmem:[%s2129_s3 + $0x20] sm:$0xff]  ;;  %v842_v53 = vpop.permute.xlu1 %841 }
 0x102   :  { %436 = vmatprep.subr.bf16.mxu0 %v400_v17  ;;  %v404_v23 = vpack.c.bf16 %v364_v22, %v360_v21  ;;  %v362_v24 = vsel %vm298_vm13, %v265_v56, %v330_v1  ;;  %v366_v25 = vsel %vm302_vm1, %v269_v8, %v334_v13  ;;  %v383_v28 = vpack.c.bf16 %v368_v26, %v367_v16 }
 0x103   :  { %549 = vmatprep.subr.bf16.mxu1 %v402_v20  ;;  %437 = vmatpush1.bf16.msra.mxu0 %v399_v49  ;;  %v406_v27 = vpack.c.bf16 %v366_v25, %v362_v24  ;;  %vm407_vm2 = vcmask 523264   ;;  %v384_v31 = vpack.c.bf16 %v370_v30, %v369_v29  ;;  %v385_v34 = vpack.c.bf16 %v372_v33, %v371_v32 }
 0x104   :  { %550 = vmatpush1.bf16.msra.mxu1 %v401_v50  ;;  %438 = vmatprep.subr.bf16.mxu0 %v404_v23  ;;  %v386_v37 = vpack.c.bf16 %v374_v36, %v373_v35  ;;  %v387_v40 = vpack.c.bf16 %v376_v39, %v375_v38  ;;  %v388_v43 = vpack.c.bf16 %v378_v42, %v377_v41  ;;  %v677_v50 = vpop.permute.xlu0 %676 }
 0x105   :  { %551 = vmatprep.subr.bf16.mxu1 %v406_v27  ;;  %v389_v46 = vpack.c.bf16 %v380_v45, %v379_v44  ;;  %v390_v49 = vpack.c.bf16 %v382_v48, %v381_v47  ;;  %v1707_v55 = vpop.permute.xlu1 %691 }
 0x107   :  { %439 = vmatpush1.bf16.msra.mxu0 %v403_v11 }
 0x108   :  { %552 = vmatpush1.bf16.msra.mxu1 %v405_v19  ;;  %v837_v52 = vpop.permute.xlu0 %836 }
 0x109   :  { %v1711_v57 = vpop.permute.xlu1 %851 }
 0x10a   :  { %1334 = vmatmul.mubr.msk.bf16.vlgmr.msra.gmra.mrb[16].mxu0 %vm407_vm2, %v383_v28 }
 0x10b   :  { %1342 = vmatmul.mubr.msk.bf16.vlgmr.msra.gmra.mrb[16].mxu1 %vm407_vm2, %v383_v28  ;;  %474 = vmatprep.mubr.bf16.mxu0 %v1356_v2 }
 0x10c   :  { %587 = vmatprep.mubr.bf16.mxu1 %v1356_v2  ;;  %v687_v54 = vpop.permute.xlu0 %686 }
 0x10d   :  { %v1715_v12 = vpop.permute.xlu1 %701 }
 0x110   :  { %v1709_v56 = vpop.permute.xlu0 %846 }
 0x111   :  { %v1722_v39 = vpop.permute.xlu1 %861 }
 0x112   :  { %1335 = vmatmul.mubr.msk.bf16.gmra.mrb[20].mxu0 %vm407_vm2, %v384_v31 }
 0x113   :  { %1343 = vmatmul.mubr.msk.bf16.gmra.mrb[20].mxu1 %vm407_vm2, %v384_v31  ;;  %484 = vmatprep.mubr.bf16.mxu0 %v1356_v2 }
 0x114   :  { %597 = vmatprep.mubr.bf16.mxu1 %v1356_v2  ;;  %v1713_v58 = vpop.permute.xlu0 %696 }
 0x118   :  { %v1717_v14 = vpop.permute.xlu0 %856 }
 0x11a   :  { %1336 = vmatmul.mubr.msk.bf16.gmra.mrb[24].mxu0 %vm407_vm2, %v385_v34 }
 0x11b   :  { %1344 = vmatmul.mubr.msk.bf16.gmra.mrb[24].mxu1 %vm407_vm2, %v385_v34  ;;  %494 = vmatprep.mubr.bf16.mxu0 %v1356_v2 }
 0x11c   :  { %607 = vmatprep.mubr.bf16.mxu1 %v1356_v2 }
 0x122   :  { %1337 = vmatmul.mubr.msk.bf16.gmra.mrb[28].mxu0 %vm407_vm2, %v386_v37 }
 0x123   :  { %1345 = vmatmul.mubr.msk.bf16.gmra.mrb[28].mxu1 %vm407_vm2, %v386_v37  ;;  %504 = vmatprep.mubr.bf16.mxu0 %v1356_v2 }
 0x124   :  { %617 = vmatprep.mubr.bf16.mxu1 %v1356_v2 }
 0x12a   :  { %1338 = vmatmul.mubr.msk.bf16.gmra.mrb[32].mxu0 %vm407_vm2, %v387_v40 }
 0x12b   :  { %1346 = vmatmul.mubr.msk.bf16.gmra.mrb[32].mxu1 %vm407_vm2, %v387_v40  ;;  %514 = vmatprep.mubr.bf16.mxu0 %v1356_v2 }
 0x12c   :  { %627 = vmatprep.mubr.bf16.mxu1 %v1356_v2 }
 0x132   :  { %1339 = vmatmul.mubr.msk.bf16.gmra.mrb[36].mxu0 %vm407_vm2, %v388_v43 }
 0x133   :  { %1347 = vmatmul.mubr.msk.bf16.gmra.mrb[36].mxu1 %vm407_vm2, %v388_v43  ;;  %524 = vmatprep.mubr.bf16.mxu0 %v1356_v2 }
 0x134   :  { %637 = vmatprep.mubr.bf16.mxu1 %v1356_v2 }
 0x13a   :  { %1340 = vmatmul.mubr.msk.bf16.gmra.mrb[40].mxu0 %vm407_vm2, %v389_v46 }
 0x13b   :  { %1348 = vmatmul.mubr.msk.bf16.gmra.mrb[40].mxu1 %vm407_vm2, %v389_v46  ;;  %534 = vmatprep.mubr.bf16.mxu0 %v1356_v2 }
 0x13c   :  { %647 = vmatprep.mubr.bf16.mxu1 %v1356_v2 }
 0x142   :  { %1341 = vmatmul.mubr.msk.bf16.gmra.mrb[44].mxu0 %vm407_vm2, %v390_v49 }
 0x143   :  { %1349 = vmatmul.mubr.msk.bf16.gmra.mrb[44].mxu1 %vm407_vm2, %v390_v49  ;;  %1236 = vmatprep.mubr.bf16.mxu0 %v1356_v2  ;;  %v1727_v49 = vpop.permute.xlu0 %706 }
 0x144   :  { %1277 = vmatprep.mubr.bf16.mxu1 %v1356_v2 }
 0x1dd   :  { %v466_v59 = vpop.f32.mrb[16].mxu0 }
 0x1de   :  { %v754_v60 = vmul.f32 %v677_v50, %v466_v59  ;;  %v579_v61 = vpop.f32.mrb[16].mxu1  ;;  %v468_v62 = vpop.f32.mrb[17].mxu0 }
 0x1df   :  { %v581_v63 = vpop.f32.mrb[17].mxu1  ;;  %v470_v1 = vpop.f32.mrb[18].mxu0  ;;  %v756_v2 = vmul.f32 %v677_v50, %v579_v61  ;;  %v755_v8 = vmul.f32 %v677_v50, %v468_v62 }
 0x1e0   :  { %v758_v3 = vmul.f32 %v682_v51, %v470_v1  ;;  %v583_v4 = vpop.f32.mrb[18].mxu1  ;;  %v472_v6 = vpop.f32.mrb[19].mxu0  ;;  %v914_v7 = vadd.f32 %v837_v52, %v754_v60  ;;  %v757_v0 = vmul.f32 %v677_v50, %v581_v63 }
 0x1e1   :  { %v585_v10 = vpop.f32.mrb[19].mxu1  ;;  %v760_v9 = vmul.f32 %v682_v51, %v583_v4  ;;  %v759_v11 = vmul.f32 %v682_v51, %v472_v6  ;;  %v916_v13 = vadd.f32 %v837_v52, %v756_v2  ;;  %v915_v18 = vadd.f32 %v837_v52, %v755_v8 }
 0x1e2   :  { %v918_v5 = vadd.f32 %v842_v53, %v758_v3  ;;  %v1042_v17 = vmul.f32 0.2, %v914_v7  ;;  %v917_v19 = vadd.f32 %v837_v52, %v757_v0  ;;  %v761_v21 = vmul.f32 %v682_v51, %v585_v10 }
 0x1e3   :  { %vm978_vm3 = vcmp.ge.f32.partialorder %v914_v7, 0.0  ;;  %v920_v25 = vadd.f32 %v842_v53, %v760_v9  ;;  %v919_v27 = vadd.f32 %v842_v53, %v759_v11  ;;  %vm980_vm5 = vcmp.ge.f32.partialorder %v916_v13, 0.0 }
 0x1e4   :  { %v1046_v20 = vmul.f32 0.2, %v918_v5  ;;  %vm982_vm4 = vcmp.ge.f32.partialorder %v918_v5, 0.0  ;;  %v1044_v28 = vmul.f32 0.2, %v916_v13  ;;  %v921_v29 = vadd.f32 %v842_v53, %v761_v21 }
 0x1e5   :  { %v476_v15 = vpop.f32.mrb[20].mxu0  ;;  %vm979_vm6 = vcmp.ge.f32.partialorder %v915_v18, 0.0  ;;  %v1043_v32 = vmul.f32 0.2, %v915_v18  ;;  %v1106_v36 = vsel %vm978_vm3, %v914_v7, %v1042_v17  ;;  %vm981_vm7 = vcmp.ge.f32.partialorder %v917_v19, 0.0  ;;  %v1743_v7 = vpop.permute.xlu1 %711 }
 0x1e6   :  { %v762_v22 = vmul.f32 %v687_v54, %v476_v15  ;;  %v589_v23 = vpop.f32.mrb[20].mxu1  ;;  %v478_v24 = vpop.f32.mrb[21].mxu0  ;;  %v1045_v37 = vmul.f32 0.2, %v917_v19  ;;  %v1110_v38 = vsel %vm982_vm4, %v918_v5, %v1046_v20  ;;  %vm984_vm8 = vcmp.ge.f32.partialorder %v920_v25, 0.0 }
 0x1e7   :  { %v591_v16 = vpop.f32.mrb[21].mxu1  ;;  %v480_v26 = vpop.f32.mrb[22].mxu0  ;;  %v764_v34 = vmul.f32 %v687_v54, %v589_v23  ;;  %v1048_v40 = vmul.f32 0.2, %v920_v25  ;;  %vm983_vm9 = vcmp.ge.f32.partialorder %v919_v27, 0.0  ;;  %v763_v41 = vmul.f32 %v687_v54, %v478_v24 }
 0x1e8   :  { %v593_v30 = vpop.f32.mrb[22].mxu1  ;;  %v482_v31 = vpop.f32.mrb[23].mxu0  ;;  %v922_v33 = vadd.f32 %v1709_v56, %v762_v22  ;;  %v1047_v42 = vmul.f32 0.2, %v919_v27  ;;  %v1049_v43 = vmul.f32 0.2, %v921_v29  ;;  %v765_v44 = vmul.f32 %v687_v54, %v591_v16 }
 0x1e9   :  { %v595_v35 = vpop.f32.mrb[23].mxu1  ;;  %v766_v45 = vmul.f32 %v1707_v55, %v480_v26  ;;  %vm985_vm10 = vcmp.ge.f32.partialorder %v921_v29, 0.0  ;;  %v924_v47 = vadd.f32 %v1709_v56, %v764_v34  ;;  %v768_v48 = vmul.f32 %v1707_v55, %v593_v30  ;;  %v1758_v24 = vpop.permute.xlu0 %866 }
 0x1ea   :  { %v1050_v46 = vmul.f32 0.2, %v922_v33  ;;  %v1108_v50 = vsel %vm980_vm5, %v916_v13, %v1044_v28  ;;  %vm986_vm11 = vcmp.ge.f32.partialorder %v922_v33, 0.0  ;;  %v767_v51 = vmul.f32 %v1707_v55, %v482_v31 }
 0x1eb   :  { %v1107_v52 = vsel %vm979_vm6, %v915_v18, %v1043_v32  ;;  %v1112_v53 = vsel %vm984_vm8, %v920_v25, %v1048_v40  ;;  %v1734_v54 = vadd.f32 %v1709_v56, %v763_v41  ;;  %v769_v59 = vmul.f32 %v1707_v55, %v595_v35  ;;  %v1766_v32 = vpop.permute.xlu1 %871 }
 0x1ec   :  { %v1109_v60 = vsel %vm981_vm7, %v917_v19, %v1045_v37  ;;  %v1739_v63 = vadd.f32 %v1709_v56, %v765_v44  ;;  %v1111_v1 = vsel %vm983_vm9, %v919_v27, %v1047_v42  ;;  %v1113_v2 = vsel %vm985_vm10, %v921_v29, %v1049_v43 }
 0x1ed   :  { %v486_v61 = vpop.f32.mrb[24].mxu0  ;;  %v1172_v3 = vpack.c.bf16 %v1110_v38, %v1106_v36  ;;  %v1746_v8 = vsel %vm986_vm11, %v922_v33, %v1050_v46  ;;  %vm988_vm12 = vcmp.ge.f32.partialorder %v924_v47, 0.0  ;;  %v926_v55 = vadd.f32 %v1711_v57, %v766_v45 }
 0x1ee   :  { %v599_v62 = vpop.f32.mrb[24].mxu1  ;;  %v488_v4 = vpop.f32.mrb[25].mxu0  ;;  %v928_v10 = vadd.f32 %v1711_v57, %v768_v48  ;;  %v1052_v0 = vmul.f32 0.2, %v924_v47  ;;  %v927_v56 = vadd.f32 %v1711_v57, %v767_v51  ;;  %v1173_v5 = vpack.c.bf16 %v1111_v1, %v1107_v52 }
 0x1ef   :  { %v601_v6 = vpop.f32.mrb[25].mxu1  ;;  %v1175_v9 = vpack.c.bf16 %v1113_v2, %v1109_v60  ;;  %v490_v11 = vpop.f32.mrb[26].mxu0  ;;  %v929_v17 = vadd.f32 %v1711_v57, %v769_v59  ;;  %v1174_v18 = vpack.c.bf16 %v1112_v53, %v1108_v50  ;;  %v770_v15 = vmul.f32 %v1713_v58, %v486_v61 }
 0x1f0   :  { %v603_v13 = vpop.f32.mrb[26].mxu1  ;;  %v772_v19 = vmul.f32 %v1713_v58, %v599_v62  ;;  %v492_v20 = vpop.f32.mrb[27].mxu0  ;;  %vm987_vm13 = vcmp.ge.f32.partialorder %v1734_v54, 0.0  ;;  %v1051_v22 = vmul.f32 0.2, %v1734_v54  ;;  %vm989_vm14 = vcmp.ge.f32.partialorder %v1739_v63, 0.0  ;;  %1204 = vmatprep.subr.bf16.mxu0 %v1173_v5 }
 0x1f1   :  { %v605_v21 = vpop.f32.mrb[27].mxu1  ;;  %1245 = vmatprep.subr.bf16.mxu1 %v1175_v9  ;;  %v771_v23 = vmul.f32 %v1713_v58, %v488_v4  ;;  %vm990_vm15 = vcmp.ge.f32.partialorder %v926_v55, 0.0  ;;  %v1054_v57 = vmul.f32 0.2, %v926_v55  ;;  %v1056_v25 = vmul.f32 0.2, %v928_v10  ;;  %1205 = vmatpush1.bf16.msra.mxu0 %v1172_v3  ;;  %v1788_v53 = vpop.permute.xlu0 %716 }
 0x1f2   :  { %1246 = vmatpush1.bf16.msra.mxu1 %v1174_v18  ;;  %v773_v27 = vmul.f32 %v1713_v58, %v601_v6  ;;  %vm992_vm0 = vcmp.ge.f32.partialorder %v928_v10, 0.0  ;;  %v930_v26 = vadd.f32 %v1717_v14, %v770_v15  ;;  %v1763_v28 = vadd.f32 %v1717_v14, %v772_v19  ;;  %v1798_v1 = vpop.permute.xlu1 %721 }
 0x1f3   :  { %v774_v29 = vmul.f32 %v1715_v12, %v490_v11  ;;  %v1053_v33 = vmul.f32 0.2, %v1739_v63  ;;  %v1055_v34 = vmul.f32 0.2, %v927_v56  ;;  %v1057_v35 = vmul.f32 0.2, %v929_v17 }
 0x1f4   :  { %v1770_v36 = vadd.f32 %v1717_v14, %v771_v23  ;;  %v1116_v58 = vsel %vm988_vm12, %v924_v47, %v1052_v0  ;;  %vm991_vm1 = vcmp.ge.f32.partialorder %v927_v56, 0.0  ;;  %vm993_vm2 = vcmp.ge.f32.partialorder %v929_v17, 0.0 }
 0x1f5   :  { %v496_v16 = vpop.f32.mrb[28].mxu0  ;;  %v776_v37 = vmul.f32 %v1715_v12, %v603_v13  ;;  %v1118_v38 = vsel %vm990_vm15, %v926_v55, %v1054_v57  ;;  %v1120_v40 = vsel %vm992_vm0, %v928_v10, %v1056_v25  ;;  %v1777_v41 = vadd.f32 %v1717_v14, %v773_v27 }
 0x1f6   :  { %v609_v30 = vpop.f32.mrb[28].mxu1  ;;  %v498_v31 = vpop.f32.mrb[29].mxu0  ;;  %v775_v42 = vmul.f32 %v1715_v12, %v492_v20  ;;  %vm994_vm3 = vcmp.ge.f32.partialorder %v930_v26, 0.0  ;;  %v1058_v45 = vmul.f32 0.2, %v930_v26  ;;  %vm996_vm4 = vcmp.ge.f32.partialorder %v1763_v28, 0.0 }
 0x1f7   :  { %v611_v43 = vpop.f32.mrb[29].mxu1  ;;  %v500_v44 = vpop.f32.mrb[30].mxu0  ;;  %v934_v46 = vadd.f32 %v1722_v39, %v774_v29  ;;  %v1060_v50 = vmul.f32 0.2, %v1763_v28  ;;  %vm995_vm5 = vcmp.ge.f32.partialorder %v1770_v36, 0.0  ;;  %v1119_v51 = vsel %vm991_vm1, %v927_v56, %v1055_v34 }
 0x1f8   :  { %v613_v47 = vpop.f32.mrb[30].mxu1  ;;  %v502_v48 = vpop.f32.mrb[31].mxu0  ;;  %v1121_v14 = vsel %vm993_vm2, %v929_v17, %v1057_v35  ;;  %v936_v59 = vadd.f32 %v1722_v39, %v776_v37  ;;  %v777_v60 = vmul.f32 %v1715_v12, %v605_v21  ;;  %v1115_v61 = vsel %vm987_vm13, %v1734_v54, %v1051_v22 }
 0x1f9   :  { %v1786_v52 = vpop.f32.mrb[31].mxu1  ;;  %v1117_v62 = vsel %vm989_vm14, %v1739_v63, %v1053_v33  ;;  %v935_v2 = vadd.f32 %v1722_v39, %v775_v42  ;;  %v1177_v3 = vpack.c.bf16 %v1119_v51, %v1115_v61  ;;  %v1176_v6 = vpack.c.bf16 %v1118_v38, %v1746_v8  ;;  %v1848_v38 = vpop.permute.xlu1 %881 }
 0x1fa   :  { %v1179_v4 = vpack.c.bf16 %v1121_v14, %v1117_v62  ;;  %v1059_v12 = vmul.f32 0.2, %v1770_v36  ;;  %v1178_v10 = vpack.c.bf16 %v1120_v40, %v1116_v58  ;;  %v778_v0 = vmul.f32 %v1727_v49, %v496_v16 }
 0x1fb   :  { %v780_v54 = vmul.f32 %v1727_v49, %v609_v30  ;;  %vm997_vm6 = vcmp.ge.f32.partialorder %v1777_v41, 0.0  ;;  %v1061_v5 = vmul.f32 0.2, %v1777_v41  ;;  %1206 = vmatprep.subr.bf16.mxu0 %v1177_v3  ;;  %v779_v8 = vmul.f32 %v1727_v49, %v498_v31 }
 0x1fc   :  { %1247 = vmatprep.subr.bf16.mxu1 %v1179_v4  ;;  %v781_v9 = vmul.f32 %v1727_v49, %v611_v43  ;;  %v1820_v17 = vsel %vm994_vm3, %v930_v26, %v1058_v45  ;;  %v1062_v18 = vmul.f32 0.2, %v934_v46  ;;  %v937_v15 = vadd.f32 %v1722_v39, %v777_v60  ;;  %1207 = vmatpush1.bf16.msra.mxu0 %v1176_v6 }
 0x1fd   :  { %v1802_v55 = vpop.f32.mrb[32].mxu0  ;;  %1248 = vmatpush1.bf16.msra.mxu1 %v1178_v10  ;;  %v938_v19 = vadd.f32 %v1758_v24, %v778_v0  ;;  %vm998_vm7 = vcmp.ge.f32.partialorder %v934_v46, 0.0  ;;  %v1064_v22 = vmul.f32 0.2, %v936_v59  ;;  %v1063_v49 = vmul.f32 0.2, %v935_v2 }
 0x1fe   :  { %v1807_v56 = vpop.f32.mrb[32].mxu1  ;;  %v1809_v63 = vpop.f32.mrb[33].mxu0  ;;  %v782_v23 = vmul.f32 %v1743_v7, %v500_v44  ;;  %vm1000_vm8 = vcmp.ge.f32.partialorder %v936_v59, 0.0  ;;  %vm999_vm9 = vcmp.ge.f32.partialorder %v935_v2, 0.0  ;;  %v1830_v25 = vadd.f32 %v1758_v24, %v780_v54 }
 0x1ff   :  { %v1815_v11 = vpop.f32.mrb[33].mxu1  ;;  %v1817_v13 = vpop.f32.mrb[34].mxu0  ;;  %v1833_v39 = vadd.f32 %v1758_v24, %v779_v8  ;;  %v1124_v27 = vsel %vm996_vm4, %v1763_v28, %v1060_v50  ;;  %v1066_v16 = vmul.f32 0.2, %v938_v19  ;;  %v1839_v26 = vadd.f32 %v1758_v24, %v781_v9 }
 0x200   :  { %v623_v20 = vpop.f32.mrb[34].mxu1  ;;  %v1824_v21 = vpop.f32.mrb[35].mxu0  ;;  %v784_v29 = vmul.f32 %v1743_v7, %v613_v47  ;;  %v1126_v30 = vsel %vm998_vm7, %v934_v46, %v1062_v18  ;;  %v1065_v31 = vmul.f32 0.2, %v937_v15  ;;  %vm1002_vm10 = vcmp.ge.f32.partialorder %v938_v19, 0.0 }
 0x201   :  { %v1827_v57 = vpop.f32.mrb[35].mxu1  ;;  %v783_v33 = vmul.f32 %v1743_v7, %v502_v48  ;;  %v1128_v34 = vsel %vm1000_vm8, %v936_v59, %v1064_v22  ;;  %vm1001_vm11 = vcmp.ge.f32.partialorder %v937_v15, 0.0  ;;  %v1844_v35 = vadd.f32 %v1766_v32, %v782_v23  ;;  %v877_v28 = vpop.permute.xlu0 %876 }
 0x202   :  { %v1127_v58 = vsel %vm999_vm9, %v935_v2, %v1063_v49  ;;  %vm1004_vm12 = vcmp.ge.f32.partialorder %v1830_v25, 0.0  ;;  %v1068_v24 = vmul.f32 0.2, %v1830_v25  ;;  %v1853_v40 = vmul.f32 0.2, %v1833_v39 }
 0x203   :  { %v1123_v42 = vsel %vm995_vm5, %v1770_v36, %v1059_v12  ;;  %v1858_v43 = vsel %vm1002_vm10, %v938_v19, %v1066_v16  ;;  %v1861_v44 = vmul.f32 0.2, %v1839_v26  ;;  %v944_v45 = vadd.f32 %v1766_v32, %v784_v29  ;;  %v1911_v19 = vpop.permute.xlu1 %731 }
 0x204   :  { %v1181_v46 = vpack.c.bf16 %v1127_v58, %v1123_v42  ;;  %vm1003_vm13 = vcmp.ge.f32.partialorder %v1833_v39, 0.0  ;;  %v943_v50 = vadd.f32 %v1766_v32, %v783_v33  ;;  %v785_v51 = vmul.f32 %v1743_v7, %v1786_v52 }
 0x205   :  { %v1846_v37 = vpop.f32.mrb[36].mxu0  ;;  %v1125_v36 = vsel %vm997_vm6, %v1777_v41, %v1061_v5  ;;  %v1129_v14 = vsel %vm1001_vm11, %v937_v15, %v1065_v31  ;;  %vm1005_vm14 = vcmp.ge.f32.partialorder %v1839_v26, 0.0  ;;  %vm1006_vm15 = vcmp.ge.f32.partialorder %v1844_v35, 0.0 }
 0x206   :  { %v1864_v47 = vpop.f32.mrb[36].mxu1  ;;  %v1866_v48 = vpop.f32.mrb[37].mxu0  ;;  %v1070_v61 = vmul.f32 0.2, %v1844_v35  ;;  %1208 = vmatprep.subr.bf16.mxu0 %v1181_v46  ;;  %v1183_v62 = vpack.c.bf16 %v1129_v14, %v1125_v36  ;;  %v1180_v7 = vpack.c.bf16 %v1126_v30, %v1820_v17  ;;  %v1182_v41 = vpack.c.bf16 %v1128_v34, %v1124_v27 }
 0x207   :  { %v1876_v59 = vpop.f32.mrb[37].mxu1  ;;  %v1878_v60 = vpop.f32.mrb[38].mxu0  ;;  %v786_v3 = vmul.f32 %v1788_v53, %v1802_v55  ;;  %v788_v4 = vmul.f32 %v1788_v53, %v1807_v56  ;;  %v787_v6 = vmul.f32 %v1788_v53, %v1809_v63  ;;  %vm1008_vm0 = vcmp.ge.f32.partialorder %v944_v45, 0.0 }
 0x208   :  { %v1884_v52 = vpop.f32.mrb[38].mxu1  ;;  %v1886_v2 = vpop.f32.mrb[39].mxu0  ;;  %1249 = vmatprep.subr.bf16.mxu1 %v1183_v62  ;;  %1209 = vmatpush1.bf16.msra.mxu0 %v1180_v7  ;;  %v789_v10 = vmul.f32 %v1788_v53, %v1815_v11  ;;  %v790_v0 = vmul.f32 %v1798_v1, %v1817_v13  ;;  %v792_v54 = vmul.f32 %v1798_v1, %v623_v20  ;;  %v1072_v55 = vmul.f32 0.2, %v944_v45 }
 0x209   :  { %v1894_v12 = vpop.f32.mrb[39].mxu1  ;;  %v945_v5 = vadd.f32 %v1766_v32, %v785_v51  ;;  %1250 = vmatpush1.bf16.msra.mxu1 %v1182_v41  ;;  %v946_v56 = vadd.f32 %v877_v28, %v786_v3  ;;  %v948_v8 = vadd.f32 %v877_v28, %v788_v4  ;;  %vm1007_vm1 = vcmp.ge.f32.partialorder %v943_v50, 0.0  ;;  %v727_v53 = vpop.permute.xlu0 %726 }
 0x20a   :  { %v1071_v63 = vmul.f32 0.2, %v943_v50  ;;  %v1902_v9 = vadd.f32 %v877_v28, %v787_v6  ;;  %v1904_v17 = vadd.f32 %v877_v28, %v789_v10  ;;  %v1909_v15 = vadd.f32 %v1848_v38, %v790_v0 }
 0x20b   :  { %vm1010_vm2 = vcmp.ge.f32.partialorder %v946_v56, 0.0  ;;  %v1074_v11 = vmul.f32 0.2, %v946_v56  ;;  %v1076_v13 = vmul.f32 0.2, %v948_v8  ;;  %vm1012_vm3 = vcmp.ge.f32.partialorder %v948_v8, 0.0 }
 0x20c   :  { %v1914_v32 = vadd.f32 %v1848_v38, %v792_v54  ;;  %v791_v20 = vmul.f32 %v1798_v1, %v1824_v21  ;;  %v793_v22 = vmul.f32 %v1798_v1, %v1827_v57  ;;  %v1132_v49 = vsel %vm1004_vm12, %v1830_v25, %v1068_v24 }
 0x20d   :  { %v1906_v18 = vpop.f32.mrb[40].mxu0  ;;  %v1134_v23 = vsel %vm1006_vm15, %v1844_v35, %v1070_v61  ;;  %vm1009_vm4 = vcmp.ge.f32.partialorder %v945_v5, 0.0  ;;  %v1073_v27 = vmul.f32 0.2, %v945_v5  ;;  %v1136_v30 = vsel %vm1008_vm0, %v944_v45, %v1072_v55 }
 0x20e   :  { %v1926_v16 = vpop.f32.mrb[40].mxu1  ;;  %v1928_v29 = vpop.f32.mrb[41].mxu0  ;;  %v1932_v21 = vsel %vm1010_vm2, %v946_v56, %v1074_v11  ;;  %v1935_v1 = vmul.f32 0.2, %v1902_v9  ;;  %v1938_v57 = vmul.f32 0.2, %v1904_v17  ;;  %v1945_v33 = vsel %vm1012_vm3, %v948_v8, %v1076_v13 }
 0x20f   :  { %v1940_v25 = vpop.f32.mrb[41].mxu1  ;;  %v1942_v31 = vpop.f32.mrb[42].mxu0  ;;  %vm1014_vm5 = vcmp.ge.f32.partialorder %v1909_v15, 0.0  ;;  %v1078_v34 = vmul.f32 0.2, %v1909_v15  ;;  %v1135_v35 = vsel %vm1007_vm1, %v943_v50, %v1071_v63  ;;  %vm1011_vm6 = vcmp.ge.f32.partialorder %v1902_v9, 0.0 }
 0x210   :  { %v1950_v58 = vpop.f32.mrb[42].mxu1  ;;  %v1952_v28 = vpop.f32.mrb[43].mxu0  ;;  %vm1013_vm7 = vcmp.ge.f32.partialorder %v1904_v17, 0.0  ;;  %vm1016_vm8 = vcmp.ge.f32.partialorder %v1914_v32, 0.0  ;;  %v951_v24 = vadd.f32 %v1848_v38, %v791_v20  ;;  %v1959_v42 = vadd.f32 %v1848_v38, %v793_v22 }
 0x211   :  { %v1131_v45 = vsel %vm1003_vm13, %v1833_v39, %v1853_v40  ;;  %v1965_v46 = vpop.f32.mrb[43].mxu1  ;;  %v887_v50 = vpop.permute.xlu0 %886  ;;  %v1133_v36 = vsel %vm1005_vm14, %v1839_v26, %v1861_v44  ;;  %v1137_v14 = vsel %vm1009_vm4, %v945_v5, %v1073_v27  ;;  %v1184_v61 = vpack.c.bf16 %v1134_v23, %v1858_v43 }
 0x212   :  { %v1185_v51 = vpack.c.bf16 %v1135_v35, %v1131_v45  ;;  %v1973_v38 = vpop.permute.xlu1 %891  ;;  %v1187_v62 = vpack.c.bf16 %v1137_v14, %v1133_v36  ;;  %v1186_v7 = vpack.c.bf16 %v1136_v30, %v1132_v49  ;;  %v794_v41 = vmul.f32 %v727_v53, %v1846_v37 }
 0x213   :  { %v796_v39 = vmul.f32 %v727_v53, %v1864_v47  ;;  %v795_v3 = vmul.f32 %v727_v53, %v1866_v48  ;;  %v797_v4 = vmul.f32 %v727_v53, %v1876_v59  ;;  %v798_v26 = vmul.f32 %v1911_v19, %v1878_v60 }
 0x214   :  { %1210 = vmatprep.subr.bf16.mxu0 %v1185_v51  ;;  %v800_v43 = vmul.f32 %v1911_v19, %v1884_v52  ;;  %v1080_v37 = vmul.f32 0.2, %v1914_v32  ;;  %vm1015_vm9 = vcmp.ge.f32.partialorder %v951_v24, 0.0  ;;  %1251 = vmatprep.subr.bf16.mxu1 %v1187_v62  ;;  %v954_v47 = vadd.f32 %v887_v50, %v794_v41 }
 0x215   :  { %v1977_v40 = vpop.f32.mrb[44].mxu0  ;;  %1211 = vmatpush1.bf16.msra.mxu0 %v1184_v61  ;;  %v956_v10 = vadd.f32 %v887_v50, %v796_v39  ;;  %1252 = vmatpush1.bf16.msra.mxu1 %v1186_v7  ;;  %v1994_v60 = vadd.f32 %v887_v50, %v795_v3  ;;  %v1996_v0 = vadd.f32 %v887_v50, %v797_v4  ;;  %v1079_v8 = vmul.f32 0.2, %v951_v24  ;;  %v737_v11 = vpop.permute.xlu0 %736 }
 0x216   :  { %v1985_v44 = vpop.f32.mrb[44].mxu1  ;;  %v1987_v6 = vpop.f32.mrb[45].mxu0  ;;  %v958_v52 = vadd.f32 %v1973_v38, %v798_v26  ;;  %v960_v54 = vadd.f32 %v1973_v38, %v800_v43  ;;  %v1142_v56 = vsel %vm1014_vm5, %v1909_v15, %v1078_v34  ;;  %v1082_v63 = vmul.f32 0.2, %v954_v47 }
 0x217   :  { %v1990_v48 = vpop.f32.mrb[45].mxu1  ;;  %v1992_v59 = vpop.f32.mrb[46].mxu0  ;;  %v1084_v53 = vmul.f32 0.2, %v956_v10  ;;  %vm1017_vm10 = vcmp.ge.f32.partialorder %v1959_v42, 0.0  ;;  %vm1018_vm11 = vcmp.ge.f32.partialorder %v954_v47, 0.0  ;;  %v799_v13 = vmul.f32 %v1911_v19, %v1886_v2 }
 0x218   :  { %v2000_v55 = vpop.f32.mrb[46].mxu1  ;;  %v2002_v5 = vpop.f32.mrb[47].mxu0  ;;  %vm1020_vm12 = vcmp.ge.f32.partialorder %v956_v10, 0.0  ;;  %v1144_v20 = vsel %vm1016_vm8, %v1914_v32, %v1080_v37  ;;  %v1081_v22 = vmul.f32 0.2, %v1959_v42  ;;  %vm1022_vm13 = vcmp.ge.f32.partialorder %v958_v52, 0.0 }
 0x219   :  { %v1086_v49 = vmul.f32 0.2, %v958_v52  ;;  %v2014_v15 = vpop.f32.mrb[47].mxu1  ;;  %v742_v23 = vpop.permute.xlu1 %741  ;;  %v2017_v27 = vmul.f32 0.2, %v1994_v60  ;;  %v801_v2 = vmul.f32 %v1911_v19, %v1894_v12  ;;  %v2024_v35 = vsel %vm1018_vm11, %v954_v47, %v1082_v63 }
 0x21a   :  { %v2020_v30 = vmul.f32 0.2, %v1996_v0  ;;  %v1088_v34 = vmul.f32 0.2, %v960_v54  ;;  %v2026_v32 = vsel %vm1020_vm12, %v956_v10, %v1084_v53  ;;  %vm1024_vm14 = vcmp.ge.f32.partialorder %v960_v54, 0.0  ;;  %v897_v62 = vpop.permute.xlu0 %896 }
 0x21b   :  { %v1143_v45 = vsel %vm1015_vm9, %v951_v24, %v1079_v8  ;;  %vm1019_vm15 = vcmp.ge.f32.partialorder %v1994_v60, 0.0  ;;  %vm1021_vm0 = vcmp.ge.f32.partialorder %v1996_v0, 0.0  ;;  %v2031_v50 = vsel %vm1022_vm13, %v958_v52, %v1086_v49 }
 0x21c   :  { %v959_v51 = vadd.f32 %v1973_v38, %v799_v13  ;;  %v1139_v12 = vsel %vm1011_vm6, %v1902_v9, %v1935_v1  ;;  %v1141_v19 = vsel %vm1013_vm7, %v1904_v17, %v1938_v57  ;;  %v1145_v24 = vsel %vm1017_vm10, %v1959_v42, %v1081_v22 }
 0x21d   :  { %v1189_v36 = vpack.c.bf16 %v1143_v45, %v1139_v12  ;;  %v1188_v14 = vpack.c.bf16 %v1142_v56, %v1932_v21  ;;  %v1190_v61 = vpack.c.bf16 %v1144_v20, %v1945_v33  ;;  %v2047_v7 = vsel %vm1024_vm14, %v960_v54, %v1088_v34  ;;  %v902_v21 = vpop.permute.xlu1 %901 }
 0x21e   :  { %v961_v41 = vadd.f32 %v1973_v38, %v801_v2  ;;  %v1191_v9 = vpack.c.bf16 %v1145_v24, %v1141_v19  ;;  %v802_v1 = vmul.f32 %v737_v11, %v1906_v18  ;;  %v804_v17 = vmul.f32 %v737_v11, %v1926_v16  ;;  %v747_v47 = vpop.permute.xlu0 %746 }
 0x21f   :  { %1212 = vmatprep.subr.bf16.mxu0 %v1189_v36  ;;  %v803_v57 = vmul.f32 %v737_v11, %v1928_v29  ;;  %v805_v39 = vmul.f32 %v737_v11, %v1940_v25  ;;  %v806_v42 = vmul.f32 %v742_v23, %v1942_v31  ;;  %vm1023_vm1 = vcmp.ge.f32.partialorder %v959_v51, 0.0 }
 0x220   :  { %1253 = vmatprep.subr.bf16.mxu1 %v1191_v9  ;;  %1213 = vmatpush1.bf16.msra.mxu0 %v1188_v14  ;;  %v962_v33 = vadd.f32 %v897_v62, %v802_v1  ;;  %v808_v3 = vmul.f32 %v742_v23, %v1950_v58  ;;  %v807_v38 = vmul.f32 %v742_v23, %v1952_v28  ;;  %v1087_v43 = vmul.f32 0.2, %v959_v51 }
 0x221   :  { %1254 = vmatpush1.bf16.msra.mxu1 %v1190_v61  ;;  %v964_v18 = vadd.f32 %v897_v62, %v804_v17  ;;  %v2057_v4 = vadd.f32 %v897_v62, %v803_v57  ;;  %v2059_v16 = vadd.f32 %v897_v62, %v805_v39  ;;  %v966_v29 = vadd.f32 %v902_v21, %v806_v42  ;;  %v752_v49 = vpop.permute.xlu1 %751 }
 0x222   :  { %vm1026_vm2 = vcmp.ge.f32.partialorder %v962_v33, 0.0  ;;  %v1090_v25 = vmul.f32 0.2, %v962_v33  ;;  %v968_v26 = vadd.f32 %v902_v21, %v808_v3  ;;  %v2061_v31 = vadd.f32 %v902_v21, %v807_v38  ;;  %v907_v12 = vpop.permute.xlu0 %906 }
 0x223   :  { %vm1025_vm3 = vcmp.ge.f32.partialorder %v961_v41, 0.0  ;;  %vm1028_vm4 = vcmp.ge.f32.partialorder %v964_v18, 0.0  ;;  %v1092_v37 = vmul.f32 0.2, %v964_v18  ;;  %v1089_v58 = vmul.f32 0.2, %v961_v41 }
 0x224   :  { %v2063_v10 = vsel %vm1026_vm2, %v962_v33, %v1090_v25  ;;  %v1091_v28 = vmul.f32 0.2, %v2057_v4  ;;  %vm1030_vm5 = vcmp.ge.f32.partialorder %v966_v29, 0.0  ;;  %vm1027_vm6 = vcmp.ge.f32.partialorder %v2057_v4, 0.0 }
 0x225   :  { %v2066_v52 = vsel %vm1028_vm4, %v964_v18, %v1092_v37  ;;  %v2070_v54 = vmul.f32 0.2, %v2059_v16  ;;  %v1094_v56 = vmul.f32 0.2, %v966_v29  ;;  %vm1032_vm7 = vcmp.ge.f32.partialorder %v968_v26, 0.0  ;;  %v912_v62 = vpop.permute.xlu1 %911 }
 0x226   :  { %v1096_v8 = vmul.f32 0.2, %v968_v26  ;;  %vm1031_vm8 = vcmp.ge.f32.partialorder %v2061_v31, 0.0  ;;  %v1095_v63 = vmul.f32 0.2, %v2061_v31  ;;  %v809_v53 = vmul.f32 %v742_v23, %v1965_v46 }
 0x227   :  { %v2075_v11 = vsel %vm1030_vm5, %v966_v29, %v1094_v56  ;;  %v1147_v13 = vsel %vm1019_vm15, %v1994_v60, %v2017_v27  ;;  %v1151_v20 = vsel %vm1023_vm1, %v959_v51, %v1087_v43  ;;  %v1149_v22 = vsel %vm1021_vm0, %v1996_v0, %v2020_v30 }
 0x228   :  { %vm1029_vm9 = vcmp.ge.f32.partialorder %v2059_v16, 0.0  ;;  %v969_v34 = vadd.f32 %v902_v21, %v809_v53  ;;  %v1193_v2 = vpack.c.bf16 %v1151_v20, %v1147_v13  ;;  %v1153_v46 = vsel %vm1025_vm3, %v961_v41, %v1089_v58 }
 0x229   :  { %v1192_v23 = vpack.c.bf16 %v2031_v50, %v2024_v35  ;;  %v1195_v45 = vpack.c.bf16 %v1153_v46, %v1149_v22  ;;  %v1194_v60 = vpack.c.bf16 %v2047_v7, %v2026_v32  ;;  %v810_v27 = vmul.f32 %v747_v47, %v1977_v40 }
 0x22a   :  { %v812_v51 = vmul.f32 %v747_v47, %v1985_v44  ;;  %v1160_v0 = vsel %vm1032_vm7, %v968_v26, %v1096_v8  ;;  %vm1033_vm10 = vcmp.ge.f32.partialorder %v969_v34, 0.0  ;;  %1214 = vmatprep.subr.bf16.mxu0 %v1193_v2  ;;  %v811_v30 = vmul.f32 %v747_v47, %v1987_v6 }
 0x22b   :  { %v813_v19 = vmul.f32 %v747_v47, %v1990_v48  ;;  %v1097_v36 = vmul.f32 0.2, %v969_v34  ;;  %1255 = vmatprep.subr.bf16.mxu1 %v1195_v45  ;;  %1215 = vmatpush1.bf16.msra.mxu0 %v1192_v23  ;;  %v970_v35 = vadd.f32 %v907_v12, %v810_v27  ;;  %v814_v32 = vmul.f32 %v752_v49, %v1992_v59 }
 0x22c   :  { %v972_v50 = vadd.f32 %v907_v12, %v812_v51  ;;  %1256 = vmatpush1.bf16.msra.mxu1 %v1194_v60  ;;  %v971_v40 = vadd.f32 %v907_v12, %v811_v30  ;;  %v816_v44 = vmul.f32 %v752_v49, %v2000_v55  ;;  %v815_v14 = vmul.f32 %v752_v49, %v2002_v5 }
 0x22d   :  { %v973_v24 = vadd.f32 %v907_v12, %v813_v19  ;;  %vm1034_vm11 = vcmp.ge.f32.partialorder %v970_v35, 0.0  ;;  %v1098_v61 = vmul.f32 0.2, %v970_v35  ;;  %v974_v1 = vadd.f32 %v912_v62, %v814_v32 }
 0x22e   :  { %vm1036_vm12 = vcmp.ge.f32.partialorder %v972_v50, 0.0  ;;  %v1100_v6 = vmul.f32 0.2, %v972_v50  ;;  %vm1035_vm13 = vcmp.ge.f32.partialorder %v971_v40, 0.0  ;;  %v1099_v48 = vmul.f32 0.2, %v971_v40 }
 0x22f   :  { %vm1037_vm14 = vcmp.ge.f32.partialorder %v973_v24, 0.0  ;;  %v1101_v7 = vmul.f32 0.2, %v973_v24  ;;  %v1162_v41 = vsel %vm1034_vm11, %v970_v35, %v1098_v61  ;;  %v976_v59 = vadd.f32 %v912_v62, %v816_v44 }
 0x230   :  { %v1164_v9 = vsel %vm1036_vm12, %v972_v50, %v1100_v6  ;;  %v975_v17 = vadd.f32 %v912_v62, %v815_v14  ;;  %v817_v57 = vmul.f32 %v752_v49, %v2014_v15  ;;  %v1155_v55 = vsel %vm1027_vm6, %v2057_v4, %v1091_v28 }
 0x231   :  { %v1159_v5 = vsel %vm1031_vm8, %v2061_v31, %v1095_v63  ;;  %vm1038_vm15 = vcmp.ge.f32.partialorder %v974_v1, 0.0  ;;  %v1102_v39 = vmul.f32 0.2, %v974_v1  ;;  %vm1040_vm0 = vcmp.ge.f32.partialorder %v976_v59, 0.0 }
 0x232   :  { %v1104_v42 = vmul.f32 0.2, %v976_v59  ;;  %vm1039_vm1 = vcmp.ge.f32.partialorder %v975_v17, 0.0  ;;  %v1103_v21 = vmul.f32 0.2, %v975_v17  ;;  %v977_v33 = vadd.f32 %v912_v62, %v817_v57 }
 0x233   :  { %v1197_v3 = vpack.c.bf16 %v1159_v5, %v1155_v55  ;;  %v1166_v38 = vsel %vm1038_vm15, %v974_v1, %v1102_v39  ;;  %v1157_v15 = vsel %vm1029_vm9, %v2059_v16, %v2070_v54  ;;  %v1161_v4 = vsel %vm1033_vm10, %v969_v34, %v1097_v36  ;;  %v1170_v54 = vld [vmem:[%s2130_s6] sm:$0x1] }
 0x234   :  { %v1168_v18 = vsel %vm1040_vm0, %v976_v59, %v1104_v42  ;;  %vm1041_vm2 = vcmp.ge.f32.partialorder %v977_v33, 0.0  ;;  %v1105_v29 = vmul.f32 0.2, %v977_v33  ;;  %v1199_v25 = vpack.c.bf16 %v1161_v4, %v1157_v15 }
 0x235   :  { %1216 = vmatprep.subr.bf16.mxu0 %v1197_v3  ;;  %v1196_v26 = vpack.c.bf16 %v2075_v11, %v2063_v10  ;;  %v1198_v31 = vpack.c.bf16 %v1160_v0, %v2066_v52  ;;  %v1163_v43 = vsel %vm1035_vm13, %v971_v40, %v1099_v48  ;;  %v1167_v37 = vsel %vm1039_vm1, %v975_v17, %v1103_v21 }
 0x236   :  { %v1165_v47 = vsel %vm1037_vm14, %v973_v24, %v1101_v7  ;;  %1257 = vmatprep.subr.bf16.mxu1 %v1199_v25  ;;  %v1201_v16 = vpack.c.bf16 %v1167_v37, %v1163_v43  ;;  %v1169_v58 = vsel %vm1041_vm2, %v977_v33, %v1105_v29  ;;  %v1200_v28 = vpack.c.bf16 %v1166_v38, %v1162_v41 }
 0x237   :  { %1217 = vmatpush1.bf16.msra.mxu0 %v1196_v26  ;;  %1258 = vmatpush1.bf16.msra.mxu1 %v1198_v31  ;;  %v1203_v56 = vpack.c.bf16 %v1169_v58, %v1165_v47  ;;  %v1202_v10 = vpack.c.bf16 %v1168_v18, %v1164_v9  ;;  %v1171_v52 = vpack.c.bf16 %v1170_v54, %v1170_v54  ;;  %v1357_v8 = vmov 1966171168  }
 0x238   :  { %1218 = vmatprep.subr.bf16.mxu0 %v1201_v16  ;;  %v1293_v63 = vunpack.c.l.s4 %v1357_v8  ;;  %v1295_v53 = vlaneseq }
 0x239   :  { %1259 = vmatprep.subr.bf16.mxu1 %v1203_v56 }
 0x23a   :  { %v1294_v11 = vunpack.c.0.s8 %v1293_v63  ;;  %v1296_v13 = vshrl.u32 %v1295_v53, 7  ;;  %vm1317_vm3 = vcmp.lt.s32.totalorder %v1295_v53, 512 }
 0x23b   :  { %1219 = vmatpush1.bf16.msra.mxu0 %v1200_v28  ;;  %1260 = vmatpush1.bf16.msra.mxu1 %v1202_v10 }
 0x23c   :  { %v1297_v22 = vsub.s32 %v1294_v11, %v1296_v13 }
 0x23e   :  { %1237 = vmatmul.mubr.bf16.vlgmr.msra.gmra.mrb[48].mxu0 %v1171_v52  ;;  %1278 = vmatmul.mubr.bf16.vlgmr.msra.gmra.mrb[48].mxu1 %v1171_v52 }
 0x311   :  { %v1238_v20 = vpop.f32.mrb[48].mxu0  ;;  %v1279_v49 = vpop.f32.mrb[48].mxu1 }
 0x312   :  { %v1240_v34 = vpop.f32.mrb[49].mxu0  ;;  %v1281_v46 = vpop.f32.mrb[49].mxu1 }
 0x313   :  { %v1290_v2 = vcombine.low %v1238_v20, %v1240_v34  ;;  %v1242_v23 = vpop.f32.mrb[50].mxu0  ;;  %v1291_v45 = vcombine.low %v1279_v49, %v1281_v46  ;;  %v1283_v60 = vpop.f32.mrb[50].mxu1 }
 0x314   :  { %v1243_v27 = vpop.f32.mrb[51].mxu0  ;;  %v1284_v12 = vpop.f32.mrb[51].mxu1 }
 0x315   :  { %v1298_v51 = vrot.slane %v1290_v2, %v1297_v22  ;;  %v1305_v0 = vrot.slane %v1291_v45, %v1297_v22 }
 0x317   :  { %v1306_v30 = vcombine.low %v1298_v51, %v1305_v0 }
 0x319   :  { %v1313_v19 = vrot.slane %v1306_v30, %v1297_v22 }
 0x31b   :  { %1319 = vst.msk [vmem:[%s2131_s7] sm:$0xf] %vm1317_vm3, %v1313_v19 }

// kernel: pixel_discriminator_forward.2
= control target key start
LH: loop header
LB: loop body
LE: loop exit
PB: predicated region body
PF: predicated region fallthrough
CT: control target
= control target key end

     0   :  { %vm142_vm0 = vcmask 1041408   ;;  %v1049_v2 = vmov 0   ;;  %vm129_vm1 = vcmask 31744   ;;  %s1677_s0 = inlined_call_operand.vmem [shape: f32[4,512], index: 0, kind: input, shape index: {}]   ;;  %s1678_s1 = inlined_call_operand.vmem [shape: f32[64,4], index: 1, kind: input, shape index: {}]   ;;  %s1679_s2 = inlined_call_operand.vmem [shape: f32[64,1], index: 2, kind: input, shape index: {}]   ;;  %s1680_s3 = inlined_call_operand.vmem [shape: f32[128,64], index: 3, kind: input, shape index: {}]   ;;  %s1681_s4 = inlined_call_operand.vmem [shape: f32[128,1], index: 4, kind: output, shape index: {0}]   ;;  %s1682_s5 = inlined_call_operand.vmem [shape: f32[128,1], index: 5, kind: output, shape index: {1}]  }
   0x1   :  { %v57_v0 = vld [vmem:[%s1677_s0] sm:$0xff]  ;;  %v58_v1 = vld [vmem:[%s1677_s0 + $0x8] sm:$0xff]  ;;  %187 = vmatprep.mubr.bf16.mxu0 %v1049_v2  ;;  %260 = vmatprep.mubr.bf16.mxu1 %v1049_v2  ;;  %v83_v14 = vld [vmem:[%s1679_s2 + $0x10] sm:$0xff] }
   0x2   :  { %v61_v3 = vcombine.high %v57_v0, %v57_v0  ;;  %v62_v4 = vcombine.high %v58_v1, %v58_v1  ;;  %v65_v5 = vpack.c.bf16 %v57_v0, %v57_v0  ;;  %v67_v6 = vpack.c.bf16 %v58_v1, %v58_v1  ;;  %1045 = vset.pattern.permute.xlu0 %v1049_v2  ;;  %v69_v7 = vld [vmem:[%s1678_s1] sm:$0xff]  ;;  %v70_v8 = vld [vmem:[%s1678_s1 + $0x8] sm:$0xff]  ;;  %v84_v17 = vld [vmem:[%s1679_s2 + $0x18] sm:$0xff] }
   0x3   :  { %1046 = vset.pattern.permute.xlu1 %v1049_v2  ;;  %v81_v13 = vld [vmem:[%s1679_s2] sm:$0xff]  ;;  %v77_v15 = vpack.c.bf16 %v70_v8, %v69_v7  ;;  %v82_v16 = vld [vmem:[%s1679_s2 + $0x8] sm:$0xff]  ;;  %v71_v19 = vld [vmem:[%s1678_s1 + $0x10] sm:$0xff] }
   0x4   :  { %v66_v9 = vpack.c.bf16 %v61_v3, %v61_v3  ;;  %v68_v10 = vpack.c.bf16 %v62_v4, %v62_v4  ;;  %v144_v11 = vsel %vm142_vm0, %v65_v5, 0  ;;  %v150_v12 = vsel %vm142_vm0, %v67_v6, 0  ;;  %91 = vperm.xlu0 %1045, %v81_v13   ;;  %101 = vperm.xlu1 %1046, %v83_v14   ;;  %v85_v18 = vld [vmem:[%s1679_s2 + $0x20] sm:$0xff]  ;;  %v72_v20 = vld [vmem:[%s1678_s1 + $0x18] sm:$0xff]  ;;  %v86_v21 = vld [vmem:[%s1679_s2 + $0x28] sm:$0xff] }
   0x5   :  { %v78_v22 = vpack.c.bf16 %v72_v20, %v71_v19  ;;  %v87_v23 = vld [vmem:[%s1679_s2 + $0x30] sm:$0xff]  ;;  %v88_v24 = vld [vmem:[%s1679_s2 + $0x38] sm:$0xff]  ;;  %v73_v25 = vld [vmem:[%s1678_s1 + $0x20] sm:$0xff] }
   0x6   :  { %1017 = vmatprep.subr.msk.bf16.mxu0 %vm142_vm0, %v66_v9  ;;  %1022 = vmatprep.subr.msk.bf16.mxu1 %vm142_vm0, %v68_v10  ;;  %v74_v26 = vld [vmem:[%s1678_s1 + $0x28] sm:$0xff]  ;;  %v75_v28 = vld [vmem:[%s1678_s1 + $0x30] sm:$0xff]  ;;  %v76_v29 = vld [vmem:[%s1678_s1 + $0x38] sm:$0xff] }
   0x7   :  { %156 = vmatpush1.bf16.msra.mxu0 %v144_v11  ;;  %229 = vmatpush1.bf16.msra.mxu1 %v150_v12  ;;  %v79_v27 = vpack.c.bf16 %v74_v26, %v73_v25  ;;  %v80_v30 = vpack.c.bf16 %v76_v29, %v75_v28 }
   0x8   :  { %96 = vperm.xlu0 %1045, %v82_v16   ;;  %106 = vperm.xlu1 %1046, %v84_v17  }
   0xa   :  { %1018 = vmatmul.mubr.msk.bf16.vlgmr.msra.gmra.mrb[0].mxu0 %vm129_vm1, %v77_v15  ;;  %1023 = vmatmul.mubr.msk.bf16.vlgmr.msra.gmra.mrb[0].mxu1 %vm129_vm1, %v77_v15 }
   0xb   :  { %197 = vmatprep.mubr.bf16.mxu0 %v1049_v2  ;;  %270 = vmatprep.mubr.bf16.mxu1 %v1049_v2 }
   0xc   :  { %111 = vperm.xlu0 %1045, %v85_v18   ;;  %116 = vperm.xlu1 %1046, %v86_v21  }
  0x10   :  { %121 = vperm.xlu0 %1045, %v87_v23   ;;  %126 = vperm.xlu1 %1046, %v88_v24  }
  0x12   :  { %1019 = vmatmul.mubr.msk.bf16.gmra.mrb[4].mxu0 %vm129_vm1, %v78_v22  ;;  %1024 = vmatmul.mubr.msk.bf16.gmra.mrb[4].mxu1 %vm129_vm1, %v78_v22 }
  0x13   :  { %207 = vmatprep.mubr.bf16.mxu0 %v1049_v2  ;;  %280 = vmatprep.mubr.bf16.mxu1 %v1049_v2 }
  0x1a   :  { %1020 = vmatmul.mubr.msk.bf16.gmra.mrb[8].mxu0 %vm129_vm1, %v79_v27  ;;  %1025 = vmatmul.mubr.msk.bf16.gmra.mrb[8].mxu1 %vm129_vm1, %v79_v27 }
  0x1b   :  { %217 = vmatprep.mubr.bf16.mxu0 %v1049_v2  ;;  %290 = vmatprep.mubr.bf16.mxu1 %v1049_v2 }
  0x22   :  { %1021 = vmatmul.mubr.msk.bf16.gmra.mrb[12].mxu0 %vm129_vm1, %v80_v30  ;;  %1026 = vmatmul.mubr.msk.bf16.gmra.mrb[12].mxu1 %vm129_vm1, %v80_v30 }
  0x23   :  { %494 = vmatprep.mubr.bf16.mxu0 %v1049_v2  ;;  %607 = vmatprep.mubr.bf16.mxu1 %v1049_v2 }
  0x83   :  { %v92_v31 = vpop.permute.xlu0 %91  ;;  %v102_v33 = vpop.permute.xlu1 %101 }
  0x87   :  { %v97_v32 = vpop.permute.xlu0 %96  ;;  %v107_v57 = vpop.permute.xlu1 %106 }
  0x8b   :  { %v112_v30 = vpop.permute.xlu0 %111 }
  0xdd   :  { %v189_v34 = vpop.f32.mrb[0].mxu0  ;;  %v262_v35 = vpop.f32.mrb[0].mxu1 }
  0xde   :  { %v190_v36 = vadd.f32 %v189_v34, %v92_v31  ;;  %v263_v37 = vadd.f32 %v262_v35, %v92_v31  ;;  %v191_v38 = vpop.f32.mrb[1].mxu0  ;;  %v264_v39 = vpop.f32.mrb[1].mxu1 }
  0xdf   :  { %v192_v40 = vadd.f32 %v191_v38, %v92_v31  ;;  %v265_v41 = vadd.f32 %v264_v39, %v92_v31  ;;  %v193_v42 = vpop.f32.mrb[2].mxu0  ;;  %v266_v43 = vpop.f32.mrb[2].mxu1 }
  0xe0   :  { %vm303_vm2 = vcmp.ge.f32.partialorder %v263_v37, 0.0  ;;  %v335_v44 = vmul.f32 0.2, %v263_v37  ;;  %vm301_vm3 = vcmp.ge.f32.partialorder %v190_v36, 0.0  ;;  %v333_v45 = vmul.f32 0.2, %v190_v36  ;;  %v117_v31 = vpop.permute.xlu1 %116 }
  0xe1   :  { %vm302_vm4 = vcmp.ge.f32.partialorder %v192_v40, 0.0  ;;  %v334_v46 = vmul.f32 0.2, %v192_v40  ;;  %v194_v47 = vadd.f32 %v193_v42, %v97_v32  ;;  %v267_v48 = vadd.f32 %v266_v43, %v97_v32  ;;  %v195_v49 = vpop.f32.mrb[3].mxu0  ;;  %v268_v50 = vpop.f32.mrb[3].mxu1 }
  0xe2   :  { %v1159_v51 = vsel %vm303_vm2, %v263_v37, %v335_v44  ;;  %v336_v52 = vmul.f32 0.2, %v265_v41  ;;  %v196_v53 = vadd.f32 %v195_v49, %v97_v32  ;;  %v269_v54 = vadd.f32 %v268_v50, %v97_v32 }
  0xe3   :  { %vm305_vm5 = vcmp.ge.f32.partialorder %v194_v47, 0.0  ;;  %v337_v55 = vmul.f32 0.2, %v194_v47  ;;  %vm307_vm6 = vcmp.ge.f32.partialorder %v267_v48, 0.0  ;;  %v339_v56 = vmul.f32 0.2, %v267_v48 }
  0xe4   :  { %v365_v58 = vsel %vm301_vm3, %v190_v36, %v333_v45  ;;  %vm304_vm7 = vcmp.ge.f32.partialorder %v265_v41, 0.0  ;;  %v338_v59 = vmul.f32 0.2, %v196_v53  ;;  %v340_v60 = vmul.f32 0.2, %v269_v54 }
  0xe5   :  { %v369_v61 = vsel %vm305_vm5, %v194_v47, %v337_v55  ;;  %v371_v62 = vsel %vm307_vm6, %v267_v48, %v339_v56  ;;  %vm306_vm8 = vcmp.ge.f32.partialorder %v196_v53, 0.0  ;;  %vm308_vm9 = vcmp.ge.f32.partialorder %v269_v54, 0.0  ;;  %v199_v63 = vpop.f32.mrb[4].mxu0  ;;  %v272_v0 = vpop.f32.mrb[4].mxu1 }
  0xe6   :  { %v421_v1 = vpack.c.bf16 %v369_v61, %v365_v58  ;;  %v423_v3 = vpack.c.bf16 %v371_v62, %v1159_v51  ;;  %v200_v4 = vadd.f32 %v199_v63, %v102_v33  ;;  %v273_v5 = vadd.f32 %v272_v0, %v102_v33  ;;  %v201_v6 = vpop.f32.mrb[5].mxu0  ;;  %v274_v7 = vpop.f32.mrb[5].mxu1 }
  0xe7   :  { %v202_v8 = vadd.f32 %v201_v6, %v102_v33  ;;  %v203_v9 = vpop.f32.mrb[6].mxu0  ;;  %v276_v10 = vpop.f32.mrb[6].mxu1  ;;  %v366_v11 = vsel %vm302_vm4, %v192_v40, %v334_v46  ;;  %v368_v12 = vsel %vm304_vm7, %v265_v41, %v336_v52  ;;  %v370_v14 = vsel %vm306_vm8, %v196_v53, %v338_v59 }
  0xe8   :  { %vm311_vm10 = vcmp.ge.f32.partialorder %v273_v5, 0.0  ;;  %v343_v13 = vmul.f32 0.2, %v273_v5  ;;  %v372_v15 = vsel %vm308_vm9, %v269_v54, %v340_v60  ;;  %vm309_vm11 = vcmp.ge.f32.partialorder %v200_v4, 0.0  ;;  %v205_v22 = vpop.f32.mrb[7].mxu0  ;;  %v278_v23 = vpop.f32.mrb[7].mxu1 }
  0xe9   :  { %v341_v16 = vmul.f32 0.2, %v200_v4  ;;  %vm310_vm12 = vcmp.ge.f32.partialorder %v202_v8, 0.0  ;;  %v275_v17 = vadd.f32 %v274_v7, %v102_v33  ;;  %v342_v19 = vmul.f32 0.2, %v202_v8  ;;  %v122_v7 = vpop.permute.xlu0 %121 }
  0xea   :  { %v1167_v18 = vsel %vm311_vm10, %v273_v5, %v343_v13  ;;  %v204_v20 = vadd.f32 %v203_v9, %v107_v57  ;;  %v277_v21 = vadd.f32 %v276_v10, %v107_v57  ;;  %v206_v24 = vadd.f32 %v205_v22, %v107_v57 }
  0xeb   :  { %v279_v25 = vadd.f32 %v278_v23, %v107_v57  ;;  %v422_v26 = vpack.c.bf16 %v370_v14, %v366_v11  ;;  %v424_v27 = vpack.c.bf16 %v372_v15, %v368_v12  ;;  %v373_v32 = vsel %vm309_vm11, %v200_v4, %v341_v16 }
  0xec   :  { %vm313_vm13 = vcmp.ge.f32.partialorder %v204_v20, 0.0  ;;  %v345_v28 = vmul.f32 0.2, %v204_v20  ;;  %vm315_vm14 = vcmp.ge.f32.partialorder %v277_v21, 0.0  ;;  %v347_v29 = vmul.f32 0.2, %v277_v21 }
  0xed   :  { %vm312_vm15 = vcmp.ge.f32.partialorder %v275_v17, 0.0  ;;  %v344_v33 = vmul.f32 0.2, %v275_v17  ;;  %v346_v34 = vmul.f32 0.2, %v206_v24  ;;  %462 = vmatprep.subr.bf16.mxu0 %v422_v26  ;;  %575 = vmatprep.subr.bf16.mxu1 %v424_v27  ;;  %vm314_vm0 = vcmp.ge.f32.partialorder %v206_v24, 0.0 }
  0xee   :  { %v377_v35 = vsel %vm313_vm13, %v204_v20, %v345_v28  ;;  %v1170_v36 = vsel %vm315_vm14, %v277_v21, %v347_v29  ;;  %vm316_vm1 = vcmp.ge.f32.partialorder %v279_v25, 0.0  ;;  %463 = vmatpush1.bf16.msra.mxu0 %v421_v1  ;;  %576 = vmatpush1.bf16.msra.mxu1 %v423_v3  ;;  %v209_v37 = vpop.f32.mrb[8].mxu0  ;;  %v282_v38 = vpop.f32.mrb[8].mxu1  ;;  %v348_v45 = vmul.f32 0.2, %v279_v25 }
  0xef   :  { %v425_v39 = vpack.c.bf16 %v377_v35, %v373_v32  ;;  %v427_v40 = vpack.c.bf16 %v1170_v36, %v1167_v18  ;;  %v210_v41 = vadd.f32 %v209_v37, %v112_v30  ;;  %v283_v42 = vadd.f32 %v282_v38, %v112_v30  ;;  %v211_v43 = vpop.f32.mrb[9].mxu0  ;;  %v284_v44 = vpop.f32.mrb[9].mxu1 }
  0xf0   :  { %v1174_v46 = vadd.f32 %v211_v43, %v112_v30  ;;  %v1176_v47 = vadd.f32 %v284_v44, %v112_v30  ;;  %v213_v48 = vpop.f32.mrb[10].mxu0  ;;  %v286_v49 = vpop.f32.mrb[10].mxu1  ;;  %v374_v50 = vsel %vm310_vm12, %v202_v8, %v342_v19  ;;  %v378_v52 = vsel %vm314_vm0, %v206_v24, %v346_v34 }
  0xf1   :  { %vm317_vm2 = vcmp.ge.f32.partialorder %v210_v41, 0.0  ;;  %v349_v51 = vmul.f32 0.2, %v210_v41  ;;  %v376_v53 = vsel %vm312_vm15, %v275_v17, %v344_v33  ;;  %vm319_vm3 = vcmp.ge.f32.partialorder %v283_v42, 0.0  ;;  %v215_v60 = vpop.f32.mrb[11].mxu0  ;;  %v288_v61 = vpop.f32.mrb[11].mxu1 }
  0xf2   :  { %v351_v54 = vmul.f32 0.2, %v283_v42  ;;  %vm318_vm4 = vcmp.ge.f32.partialorder %v1174_v46, 0.0  ;;  %v350_v55 = vmul.f32 0.2, %v1174_v46  ;;  %v214_v58 = vadd.f32 %v213_v48, %v117_v31  ;;  %v127_v8 = vpop.permute.xlu1 %126 }
  0xf3   :  { %v1183_v56 = vsel %vm317_vm2, %v210_v41, %v349_v51  ;;  %v1186_v57 = vmul.f32 0.2, %v1176_v47  ;;  %v287_v59 = vadd.f32 %v286_v49, %v117_v31  ;;  %v216_v62 = vadd.f32 %v215_v60, %v117_v31  ;;  %v399_v60 = vld [vmem:[%s1680_s3 + $0x10] sm:$0xff] }
  0xf4   :  { %v1188_v63 = vadd.f32 %v288_v61, %v117_v31  ;;  %v426_v0 = vpack.c.bf16 %v378_v52, %v374_v50  ;;  %v380_v1 = vsel %vm316_vm1, %v279_v25, %v348_v45  ;;  %vm320_vm5 = vcmp.ge.f32.partialorder %v1176_v47, 0.0  ;;  %v400_v61 = vld [vmem:[%s1680_s3 + $0x18] sm:$0xff] }
  0xf5   :  { %v219_v3 = vpop.f32.mrb[12].mxu0  ;;  %v292_v4 = vpop.f32.mrb[12].mxu1  ;;  %vm321_vm6 = vcmp.ge.f32.partialorder %v214_v58, 0.0  ;;  %v353_v5 = vmul.f32 0.2, %v214_v58  ;;  %vm323_vm7 = vcmp.ge.f32.partialorder %v287_v59, 0.0  ;;  %v1193_v9 = vsel %vm319_vm3, %v283_v42, %v351_v54 }
  0xf6   :  { %v355_v6 = vmul.f32 0.2, %v287_v59  ;;  %vm322_vm8 = vcmp.ge.f32.partialorder %v216_v62, 0.0  ;;  %v354_v10 = vmul.f32 0.2, %v216_v62  ;;  %vm324_vm9 = vcmp.ge.f32.partialorder %v1188_v63, 0.0  ;;  %464 = vmatprep.subr.bf16.mxu0 %v426_v0 }
  0xf7   :  { %v385_v11 = vsel %vm321_vm6, %v214_v58, %v353_v5  ;;  %v428_v13 = vpack.c.bf16 %v380_v1, %v376_v53  ;;  %465 = vmatpush1.bf16.msra.mxu0 %v425_v39  ;;  %v220_v14 = vadd.f32 %v219_v3, %v122_v7  ;;  %v221_v15 = vpop.f32.mrb[13].mxu0  ;;  %v294_v16 = vpop.f32.mrb[13].mxu1  ;;  %v293_v20 = vadd.f32 %v292_v4, %v122_v7  ;;  %v402_v0 = vld [vmem:[%s1680_s3 + $0x28] sm:$0xff]  ;;  %v403_v3 = vld [vmem:[%s1680_s3 + $0x30] sm:$0xff]  ;;  %v404_v4 = vld [vmem:[%s1680_s3 + $0x38] sm:$0xff] }
  0xf8   :  { %v387_v12 = vsel %vm323_vm7, %v287_v59, %v355_v6  ;;  %v429_v17 = vpack.c.bf16 %v385_v11, %v1183_v56  ;;  %v222_v21 = vadd.f32 %v221_v15, %v122_v7  ;;  %v223_v22 = vpop.f32.mrb[14].mxu0  ;;  %v296_v23 = vpop.f32.mrb[14].mxu1  ;;  %v295_v25 = vadd.f32 %v294_v16, %v122_v7  ;;  %v405_v6 = vld [vmem:[%s1680_s3 + $0x40] sm:$0xff]  ;;  %v406_v7 = vld [vmem:[%s1680_s3 + $0x48] sm:$0xff]  ;;  %v411_v15 = vld [vmem:[%s1680_s3 + $0x70] sm:$0xff] }
  0xf9   :  { %v431_v19 = vpack.c.bf16 %v387_v12, %v1193_v9  ;;  %577 = vmatprep.subr.bf16.mxu1 %v428_v13  ;;  %vm325_vm10 = vcmp.ge.f32.partialorder %v220_v14, 0.0  ;;  %v357_v24 = vmul.f32 0.2, %v220_v14  ;;  %v224_v26 = vadd.f32 %v223_v22, %v127_v8  ;;  %v225_v27 = vpop.f32.mrb[15].mxu0  ;;  %v298_v28 = vpop.f32.mrb[15].mxu1  ;;  %v407_v9 = vld [vmem:[%s1680_s3 + $0x50] sm:$0xff] }
  0xfa   :  { %v356_v29 = vmul.f32 0.2, %v1188_v63  ;;  %578 = vmatpush1.bf16.msra.mxu1 %v427_v40  ;;  %vm327_vm11 = vcmp.ge.f32.partialorder %v293_v20, 0.0  ;;  %v359_v30 = vmul.f32 0.2, %v293_v20  ;;  %vm326_vm12 = vcmp.ge.f32.partialorder %v222_v21, 0.0 }
  0xfb   :  { %v389_v31 = vsel %vm325_vm10, %v220_v14, %v357_v24  ;;  %v358_v32 = vmul.f32 0.2, %v222_v21  ;;  %vm328_vm13 = vcmp.ge.f32.partialorder %v295_v25, 0.0  ;;  %vm329_vm14 = vcmp.ge.f32.partialorder %v224_v26, 0.0  ;;  %v409_v12 = vld [vmem:[%s1680_s3 + $0x60] sm:$0xff]  ;;  %v410_v13 = vld [vmem:[%s1680_s3 + $0x68] sm:$0xff] }
  0xfc   :  { %v360_v33 = vmul.f32 0.2, %v295_v25  ;;  %v361_v34 = vmul.f32 0.2, %v224_v26  ;;  %v297_v35 = vadd.f32 %v296_v23, %v127_v8  ;;  %v226_v37 = vadd.f32 %v225_v27, %v127_v8  ;;  %v412_v16 = vld [vmem:[%s1680_s3 + $0x78] sm:$0xff] }
  0xfd   :  { %v391_v38 = vsel %vm327_vm11, %v293_v20, %v359_v30  ;;  %v299_v39 = vadd.f32 %v298_v28, %v127_v8  ;;  %v382_v41 = vsel %vm318_vm4, %v1174_v46, %v350_v55  ;;  %v386_v18 = vsel %vm322_vm8, %v216_v62, %v354_v10  ;;  %v408_v10 = vld [vmem:[%s1680_s3 + $0x58] sm:$0xff] }
  0xfe   :  { %v393_v36 = vsel %vm329_vm14, %v224_v26, %v361_v34  ;;  %vm331_vm15 = vcmp.ge.f32.partialorder %v297_v35, 0.0  ;;  %v363_v40 = vmul.f32 0.2, %v297_v35  ;;  %vm330_vm0 = vcmp.ge.f32.partialorder %v226_v37, 0.0 }
  0xff   :  { %v433_v42 = vpack.c.bf16 %v393_v36, %v389_v31  ;;  %v362_v43 = vmul.f32 0.2, %v226_v37  ;;  %vm332_vm1 = vcmp.ge.f32.partialorder %v299_v39, 0.0  ;;  %v364_v44 = vmul.f32 0.2, %v299_v39 }
 0x100   :  { %v395_v45 = vsel %vm331_vm15, %v297_v35, %v363_v40  ;;  %v430_v48 = vpack.c.bf16 %v386_v18, %v382_v41  ;;  %v384_v49 = vsel %vm320_vm5, %v1176_v47, %v1186_v57  ;;  %v388_v46 = vsel %vm324_vm9, %v1188_v63, %v356_v29  ;;  %v397_v47 = vld [vmem:[%s1680_s3] sm:$0xff]  ;;  %v398_v57 = vld [vmem:[%s1680_s3 + $0x8] sm:$0xff] }
 0x101   :  { %v435_v50 = vpack.c.bf16 %v395_v45, %v391_v38  ;;  %v432_v51 = vpack.c.bf16 %v388_v46, %v384_v49  ;;  %v390_v52 = vsel %vm326_vm12, %v222_v21, %v358_v32  ;;  %v394_v53 = vsel %vm330_vm0, %v226_v37, %v362_v43  ;;  %v401_v63 = vld [vmem:[%s1680_s3 + $0x20] sm:$0xff] }
 0x102   :  { %466 = vmatprep.subr.bf16.mxu0 %v430_v48  ;;  %v434_v54 = vpack.c.bf16 %v394_v53, %v390_v52  ;;  %v392_v55 = vsel %vm328_vm13, %v295_v25, %v360_v33  ;;  %v396_v56 = vsel %vm332_vm1, %v299_v39, %v364_v44  ;;  %v413_v59 = vpack.c.bf16 %v398_v57, %v397_v47 }
 0x103   :  { %579 = vmatprep.subr.bf16.mxu1 %v432_v51  ;;  %467 = vmatpush1.bf16.msra.mxu0 %v429_v17  ;;  %v436_v58 = vpack.c.bf16 %v396_v56, %v392_v55  ;;  %vm437_vm2 = vcmask 523264   ;;  %v414_v62 = vpack.c.bf16 %v400_v61, %v399_v60  ;;  %v415_v1 = vpack.c.bf16 %v402_v0, %v401_v63 }
 0x104   :  { %580 = vmatpush1.bf16.msra.mxu1 %v431_v19  ;;  %468 = vmatprep.subr.bf16.mxu0 %v434_v54  ;;  %v416_v5 = vpack.c.bf16 %v404_v4, %v403_v3  ;;  %v417_v8 = vpack.c.bf16 %v406_v7, %v405_v6  ;;  %v418_v11 = vpack.c.bf16 %v408_v10, %v407_v9  ;;  %vm24_vm3 = vcmask 7168  }
 0x105   :  { %581 = vmatprep.subr.bf16.mxu1 %v436_v58  ;;  %v419_v14 = vpack.c.bf16 %v410_v13, %v409_v12  ;;  %v420_v17 = vpack.c.bf16 %v412_v16, %v411_v15  ;;  %v1050_v19 = vmov 0.0  }
 0x106   :  { %25 = vst.msk [vmem:[%s1681_s4] sm:$0xff] %vm24_vm3, %v1050_v19  ;;  %26 = vst.msk [vmem:[%s1681_s4 + $0x8] sm:$0xff] %vm24_vm3, %v1050_v19 }
 0x107   :  { %469 = vmatpush1.bf16.msra.mxu0 %v433_v42  ;;  %27 = vst.msk [vmem:[%s1681_s4 + $0x10] sm:$0xff] %vm24_vm3, %v1050_v19  ;;  %28 = vst.msk [vmem:[%s1681_s4 + $0x18] sm:$0xff] %vm24_vm3, %v1050_v19 }
 0x108   :  { %582 = vmatpush1.bf16.msra.mxu1 %v435_v50  ;;  %29 = vst.msk [vmem:[%s1681_s4 + $0x20] sm:$0xff] %vm24_vm3, %v1050_v19  ;;  %30 = vst.msk [vmem:[%s1681_s4 + $0x28] sm:$0xff] %vm24_vm3, %v1050_v19 }
 0x109   :  { %31 = vst.msk [vmem:[%s1681_s4 + $0x30] sm:$0xff] %vm24_vm3, %v1050_v19  ;;  %32 = vst.msk [vmem:[%s1681_s4 + $0x38] sm:$0xff] %vm24_vm3, %v1050_v19 }
 0x10a   :  { %1027 = vmatmul.mubr.msk.bf16.vlgmr.msra.gmra.mrb[16].mxu0 %vm437_vm2, %v413_v59  ;;  %33 = vst.msk [vmem:[%s1681_s4 + $0x40] sm:$0xff] %vm24_vm3, %v1050_v19  ;;  %34 = vst.msk [vmem:[%s1681_s4 + $0x48] sm:$0xff] %vm24_vm3, %v1050_v19 }
 0x10b   :  { %1035 = vmatmul.mubr.msk.bf16.vlgmr.msra.gmra.mrb[16].mxu1 %vm437_vm2, %v413_v59  ;;  %504 = vmatprep.mubr.bf16.mxu0 %v1049_v2  ;;  %35 = vst.msk [vmem:[%s1681_s4 + $0x50] sm:$0xff] %vm24_vm3, %v1050_v19  ;;  %36 = vst.msk [vmem:[%s1681_s4 + $0x58] sm:$0xff] %vm24_vm3, %v1050_v19 }
 0x10c   :  { %617 = vmatprep.mubr.bf16.mxu1 %v1049_v2  ;;  %37 = vst.msk [vmem:[%s1681_s4 + $0x60] sm:$0xff] %vm24_vm3, %v1050_v19  ;;  %38 = vst.msk [vmem:[%s1681_s4 + $0x68] sm:$0xff] %vm24_vm3, %v1050_v19 }
 0x10d   :  { %39 = vst.msk [vmem:[%s1681_s4 + $0x70] sm:$0xff] %vm24_vm3, %v1050_v19  ;;  %40 = vst.msk [vmem:[%s1681_s4 + $0x78] sm:$0xff] %vm24_vm3, %v1050_v19 }
 0x10e   :  { %42 = vst.msk [vmem:[%s1682_s5 + $0x8] sm:$0xff] %vm24_vm3, %v1050_v19  ;;  %41 = vst.msk [vmem:[%s1682_s5] sm:$0xff] %vm24_vm3, %v1050_v19 }
 0x10f   :  { %43 = vst.msk [vmem:[%s1682_s5 + $0x10] sm:$0xff] %vm24_vm3, %v1050_v19  ;;  %44 = vst.msk [vmem:[%s1682_s5 + $0x18] sm:$0xff] %vm24_vm3, %v1050_v19 }
 0x110   :  { %45 = vst.msk [vmem:[%s1682_s5 + $0x20] sm:$0xff] %vm24_vm3, %v1050_v19  ;;  %46 = vst.msk [vmem:[%s1682_s5 + $0x28] sm:$0xff] %vm24_vm3, %v1050_v19 }
 0x111   :  { %47 = vst.msk [vmem:[%s1682_s5 + $0x30] sm:$0xff] %vm24_vm3, %v1050_v19  ;;  %48 = vst.msk [vmem:[%s1682_s5 + $0x38] sm:$0xff] %vm24_vm3, %v1050_v19 }
 0x112   :  { %1028 = vmatmul.mubr.msk.bf16.gmra.mrb[20].mxu0 %vm437_vm2, %v414_v62  ;;  %49 = vst.msk [vmem:[%s1682_s5 + $0x40] sm:$0xff] %vm24_vm3, %v1050_v19  ;;  %50 = vst.msk [vmem:[%s1682_s5 + $0x48] sm:$0xff] %vm24_vm3, %v1050_v19 }
 0x113   :  { %1036 = vmatmul.mubr.msk.bf16.gmra.mrb[20].mxu1 %vm437_vm2, %v414_v62  ;;  %514 = vmatprep.mubr.bf16.mxu0 %v1049_v2  ;;  %51 = vst.msk [vmem:[%s1682_s5 + $0x50] sm:$0xff] %vm24_vm3, %v1050_v19  ;;  %52 = vst.msk [vmem:[%s1682_s5 + $0x58] sm:$0xff] %vm24_vm3, %v1050_v19 }
 0x114   :  { %627 = vmatprep.mubr.bf16.mxu1 %v1049_v2  ;;  %53 = vst.msk [vmem:[%s1682_s5 + $0x60] sm:$0xff] %vm24_vm3, %v1050_v19  ;;  %54 = vst.msk [vmem:[%s1682_s5 + $0x68] sm:$0xff] %vm24_vm3, %v1050_v19 }
 0x115   :  { %55 = vst.msk [vmem:[%s1682_s5 + $0x70] sm:$0xff] %vm24_vm3, %v1050_v19  ;;  %56 = vst.msk [vmem:[%s1682_s5 + $0x78] sm:$0xff] %vm24_vm3, %v1050_v19 }
 0x11a   :  { %1029 = vmatmul.mubr.msk.bf16.gmra.mrb[24].mxu0 %vm437_vm2, %v415_v1 }
 0x11b   :  { %1037 = vmatmul.mubr.msk.bf16.gmra.mrb[24].mxu1 %vm437_vm2, %v415_v1  ;;  %524 = vmatprep.mubr.bf16.mxu0 %v1049_v2 }
 0x11c   :  { %637 = vmatprep.mubr.bf16.mxu1 %v1049_v2 }
 0x122   :  { %1030 = vmatmul.mubr.msk.bf16.gmra.mrb[28].mxu0 %vm437_vm2, %v416_v5 }
 0x123   :  { %1038 = vmatmul.mubr.msk.bf16.gmra.mrb[28].mxu1 %vm437_vm2, %v416_v5  ;;  %534 = vmatprep.mubr.bf16.mxu0 %v1049_v2 }
 0x124   :  { %647 = vmatprep.mubr.bf16.mxu1 %v1049_v2 }
 0x12a   :  { %1031 = vmatmul.mubr.msk.bf16.gmra.mrb[32].mxu0 %vm437_vm2, %v417_v8 }
 0x12b   :  { %1039 = vmatmul.mubr.msk.bf16.gmra.mrb[32].mxu1 %vm437_vm2, %v417_v8  ;;  %544 = vmatprep.mubr.bf16.mxu0 %v1049_v2 }
 0x12c   :  { %657 = vmatprep.mubr.bf16.mxu1 %v1049_v2 }
 0x132   :  { %1032 = vmatmul.mubr.msk.bf16.gmra.mrb[36].mxu0 %vm437_vm2, %v418_v11 }
 0x133   :  { %1040 = vmatmul.mubr.msk.bf16.gmra.mrb[36].mxu1 %vm437_vm2, %v418_v11  ;;  %554 = vmatprep.mubr.bf16.mxu0 %v1049_v2 }
 0x134   :  { %667 = vmatprep.mubr.bf16.mxu1 %v1049_v2 }
 0x13a   :  { %1033 = vmatmul.mubr.msk.bf16.gmra.mrb[40].mxu0 %vm437_vm2, %v419_v14 }
 0x13b   :  { %1041 = vmatmul.mubr.msk.bf16.gmra.mrb[40].mxu1 %vm437_vm2, %v419_v14  ;;  %564 = vmatprep.mubr.bf16.mxu0 %v1049_v2 }
 0x13c   :  { %677 = vmatprep.mubr.bf16.mxu1 %v1049_v2 }
 0x142   :  { %1034 = vmatmul.mubr.msk.bf16.gmra.mrb[44].mxu0 %vm437_vm2, %v420_v17 }
 0x143   :  { %1042 = vmatmul.mubr.msk.bf16.gmra.mrb[44].mxu1 %vm437_vm2, %v420_v17 }
 0x1dd   :  { %v496_v2 = vpop.f32.mrb[16].mxu0 }
 0x1de   :  { %v833_v20 = vmul.f32 %v496_v2, %v496_v2  ;;  %v498_v21 = vpop.f32.mrb[17].mxu0  ;;  %v609_v22 = vpop.f32.mrb[16].mxu1 }
 0x1df   :  { %v704_v23 = vadd.f32 %v498_v21, %v496_v2  ;;  %v834_v24 = vmul.f32 %v498_v21, %v498_v21  ;;  %v500_v25 = vpop.f32.mrb[18].mxu0  ;;  %v835_v26 = vmul.f32 %v609_v22, %v609_v22  ;;  %v611_v27 = vpop.f32.mrb[17].mxu1 }
 0x1e0   :  { %v837_v28 = vmul.f32 %v500_v25, %v500_v25  ;;  %v502_v29 = vpop.f32.mrb[19].mxu0  ;;  %v613_v30 = vpop.f32.mrb[18].mxu1  ;;  %v836_v37 = vmul.f32 %v611_v27, %v611_v27 }
 0x1e1   :  { %v897_v31 = vadd.f32 %v834_v24, %v833_v20  ;;  %v709_v32 = vadd.f32 %v502_v29, %v500_v25  ;;  %v838_v33 = vmul.f32 %v502_v29, %v502_v29  ;;  %v705_v34 = vadd.f32 %v704_v23, %v609_v22  ;;  %v615_v35 = vpop.f32.mrb[19].mxu1 }
 0x1e2   :  { %v839_v38 = vmul.f32 %v613_v30, %v613_v30  ;;  %v840_v40 = vmul.f32 %v615_v35, %v615_v35 }
 0x1e3   :  { %v902_v39 = vadd.f32 %v838_v33, %v837_v28  ;;  %v710_v41 = vadd.f32 %v709_v32, %v613_v30  ;;  %v706_v18 = vadd.f32 %v705_v34, %v611_v27  ;;  %v898_v36 = vadd.f32 %v897_v31, %v835_v26 }
 0x1e5   :  { %707 = vadd.xlane.f32.xlu0 %v706_v18  ;;  %v506_v42 = vpop.f32.mrb[20].mxu0  ;;  %v711_v43 = vadd.f32 %v710_v41, %v615_v35  ;;  %v903_v44 = vadd.f32 %v902_v39, %v839_v38  ;;  %v899_v45 = vadd.f32 %v898_v36, %v836_v37 }
 0x1e6   :  { %v841_v48 = vmul.f32 %v506_v42, %v506_v42  ;;  %v508_v49 = vpop.f32.mrb[21].mxu0  ;;  %v619_v46 = vpop.f32.mrb[20].mxu1 }
 0x1e7   :  { %v714_v50 = vadd.f32 %v508_v49, %v506_v42  ;;  %v842_v51 = vmul.f32 %v508_v49, %v508_v49  ;;  %712 = vadd.xlane.f32.xlu1 %v711_v43  ;;  %v510_v52 = vpop.f32.mrb[22].mxu0  ;;  %v843_v53 = vmul.f32 %v619_v46, %v619_v46  ;;  %v904_v54 = vadd.f32 %v903_v44, %v840_v40  ;;  %v621_v55 = vpop.f32.mrb[21].mxu1 }
 0x1e8   :  { %v845_v56 = vmul.f32 %v510_v52, %v510_v52  ;;  %v512_v58 = vpop.f32.mrb[23].mxu0  ;;  %v623_v47 = vpop.f32.mrb[22].mxu1  ;;  %v844_v63 = vmul.f32 %v621_v55, %v621_v55 }
 0x1e9   :  { %v907_v57 = vadd.f32 %v842_v51, %v841_v48  ;;  %v715_v59 = vadd.f32 %v714_v50, %v619_v46  ;;  %905 = vadd.xlane.f32.xlu0 %v904_v54  ;;  %v719_v60 = vadd.f32 %v512_v58, %v510_v52  ;;  %v846_v61 = vmul.f32 %v512_v58, %v512_v58  ;;  %v625_v62 = vpop.f32.mrb[23].mxu1 }
 0x1ea   :  { %v847_v0 = vmul.f32 %v623_v47, %v623_v47  ;;  %v848_v6 = vmul.f32 %v625_v62, %v625_v62 }
 0x1eb   :  { %v912_v1 = vadd.f32 %v846_v61, %v845_v56  ;;  %v720_v3 = vadd.f32 %v719_v60, %v623_v47  ;;  %900 = vadd.xlane.f32.xlu1 %v899_v45  ;;  %v716_v4 = vadd.f32 %v715_v59, %v621_v55  ;;  %v908_v5 = vadd.f32 %v907_v57, %v843_v53 }
 0x1ed   :  { %717 = vadd.xlane.f32.xlu0 %v716_v4  ;;  %v516_v7 = vpop.f32.mrb[24].mxu0  ;;  %v721_v8 = vadd.f32 %v720_v3, %v625_v62  ;;  %v909_v9 = vadd.f32 %v908_v5, %v844_v63  ;;  %v913_v10 = vadd.f32 %v912_v1, %v847_v0 }
 0x1ee   :  { %v849_v11 = vmul.f32 %v516_v7, %v516_v7  ;;  %v518_v12 = vpop.f32.mrb[25].mxu0  ;;  %v629_v13 = vpop.f32.mrb[24].mxu1 }
 0x1ef   :  { %v724_v14 = vadd.f32 %v518_v12, %v516_v7  ;;  %v850_v15 = vmul.f32 %v518_v12, %v518_v12  ;;  %v520_v16 = vpop.f32.mrb[26].mxu0  ;;  %v851_v17 = vmul.f32 %v629_v13, %v629_v13  ;;  %910 = vadd.xlane.f32.xlu1 %v909_v9  ;;  %v631_v2 = vpop.f32.mrb[25].mxu1  ;;  %v914_v20 = vadd.f32 %v913_v10, %v848_v6 }
 0x1f0   :  { %v853_v21 = vmul.f32 %v520_v16, %v520_v16  ;;  %v522_v22 = vpop.f32.mrb[27].mxu0  ;;  %v852_v23 = vmul.f32 %v631_v2, %v631_v2  ;;  %v633_v24 = vpop.f32.mrb[26].mxu1 }
 0x1f1   :  { %v917_v25 = vadd.f32 %v850_v15, %v849_v11  ;;  %722 = vadd.xlane.f32.xlu0 %v721_v8  ;;  %v725_v26 = vadd.f32 %v724_v14, %v629_v13  ;;  %v729_v27 = vadd.f32 %v522_v22, %v520_v16  ;;  %v854_v28 = vmul.f32 %v522_v22, %v522_v22  ;;  %v635_v29 = vpop.f32.mrb[27].mxu1 }
 0x1f2   :  { %v855_v30 = vmul.f32 %v633_v24, %v633_v24  ;;  %v856_v35 = vmul.f32 %v635_v29, %v635_v29 }
 0x1f3   :  { %v922_v31 = vadd.f32 %v854_v28, %v853_v21  ;;  %v730_v32 = vadd.f32 %v729_v27, %v633_v24  ;;  %v726_v33 = vadd.f32 %v725_v26, %v631_v2  ;;  %v918_v34 = vadd.f32 %v917_v25, %v851_v17 }
 0x1f5   :  { %915 = vadd.xlane.f32.xlu0 %v914_v20  ;;  %v526_v37 = vpop.f32.mrb[28].mxu0  ;;  %727 = vadd.xlane.f32.xlu1 %v726_v33  ;;  %v731_v38 = vadd.f32 %v730_v32, %v635_v29  ;;  %v919_v39 = vadd.f32 %v918_v34, %v852_v23  ;;  %v923_v41 = vadd.f32 %v922_v31, %v855_v30 }
 0x1f6   :  { %v857_v18 = vmul.f32 %v526_v37, %v526_v37  ;;  %v528_v36 = vpop.f32.mrb[29].mxu0  ;;  %v639_v40 = vpop.f32.mrb[28].mxu1 }
 0x1f7   :  { %v734_v42 = vadd.f32 %v528_v36, %v526_v37  ;;  %v858_v43 = vmul.f32 %v528_v36, %v528_v36  ;;  %v530_v44 = vpop.f32.mrb[30].mxu0  ;;  %v859_v45 = vmul.f32 %v639_v40, %v639_v40  ;;  %v641_v48 = vpop.f32.mrb[29].mxu1  ;;  %v924_v49 = vadd.f32 %v923_v41, %v856_v35 }
 0x1f8   :  { %v861_v46 = vmul.f32 %v530_v44, %v530_v44  ;;  %v532_v50 = vpop.f32.mrb[31].mxu0  ;;  %v860_v51 = vmul.f32 %v641_v48, %v641_v48  ;;  %v643_v52 = vpop.f32.mrb[30].mxu1 }
 0x1f9   :  { %v927_v19 = vadd.f32 %v858_v43, %v857_v18  ;;  %732 = vadd.xlane.f32.xlu0 %v731_v38  ;;  %v739_v53 = vadd.f32 %v532_v50, %v530_v44  ;;  %v862_v54 = vmul.f32 %v532_v50, %v532_v50  ;;  %v735_v55 = vadd.f32 %v734_v42, %v639_v40  ;;  %v645_v56 = vpop.f32.mrb[31].mxu1 }
 0x1fa   :  { %v863_v58 = vmul.f32 %v643_v52, %v643_v52  ;;  %920 = vadd.xlane.f32.xlu1 %v919_v39  ;;  %v864_v61 = vmul.f32 %v645_v56, %v645_v56 }
 0x1fb   :  { %v932_v47 = vadd.f32 %v862_v54, %v861_v46  ;;  %v740_v57 = vadd.f32 %v739_v53, %v643_v52  ;;  %v736_v59 = vadd.f32 %v735_v55, %v641_v48  ;;  %v928_v60 = vadd.f32 %v927_v19, %v859_v45 }
 0x1fd   :  { %925 = vadd.xlane.f32.xlu0 %v924_v49  ;;  %v536_v62 = vpop.f32.mrb[32].mxu0  ;;  %v741_v63 = vadd.f32 %v740_v57, %v645_v56  ;;  %v929_v0 = vadd.f32 %v928_v60, %v860_v51  ;;  %v933_v1 = vadd.f32 %v932_v47, %v863_v58 }
 0x1fe   :  { %v865_v3 = vmul.f32 %v536_v62, %v536_v62  ;;  %737 = vadd.xlane.f32.xlu1 %v736_v59  ;;  %v538_v4 = vpop.f32.mrb[33].mxu0  ;;  %v649_v5 = vpop.f32.mrb[32].mxu1 }
 0x1ff   :  { %v744_v6 = vadd.f32 %v538_v4, %v536_v62  ;;  %v866_v7 = vmul.f32 %v538_v4, %v538_v4  ;;  %v540_v8 = vpop.f32.mrb[34].mxu0  ;;  %v867_v9 = vmul.f32 %v649_v5, %v649_v5  ;;  %v651_v10 = vpop.f32.mrb[33].mxu1  ;;  %v934_v11 = vadd.f32 %v933_v1, %v864_v61 }
 0x200   :  { %v869_v12 = vmul.f32 %v540_v8, %v540_v8  ;;  %v542_v13 = vpop.f32.mrb[35].mxu0  ;;  %v868_v14 = vmul.f32 %v651_v10, %v651_v10  ;;  %v653_v15 = vpop.f32.mrb[34].mxu1 }
 0x201   :  { %v937_v16 = vadd.f32 %v866_v7, %v865_v3  ;;  %742 = vadd.xlane.f32.xlu0 %v741_v63  ;;  %v749_v17 = vadd.f32 %v542_v13, %v540_v8  ;;  %v870_v2 = vmul.f32 %v542_v13, %v542_v13  ;;  %v745_v20 = vadd.f32 %v744_v6, %v649_v5  ;;  %v655_v21 = vpop.f32.mrb[35].mxu1 }
 0x202   :  { %v871_v22 = vmul.f32 %v653_v15, %v653_v15  ;;  %930 = vadd.xlane.f32.xlu1 %v929_v0  ;;  %v872_v27 = vmul.f32 %v655_v21, %v655_v21 }
 0x203   :  { %v942_v23 = vadd.f32 %v870_v2, %v869_v12  ;;  %v750_v24 = vadd.f32 %v749_v17, %v653_v15  ;;  %v746_v25 = vadd.f32 %v745_v20, %v651_v10  ;;  %v938_v26 = vadd.f32 %v937_v16, %v867_v9 }
 0x205   :  { %935 = vadd.xlane.f32.xlu0 %v934_v11  ;;  %v546_v28 = vpop.f32.mrb[36].mxu0  ;;  %v751_v29 = vadd.f32 %v750_v24, %v655_v21  ;;  %v939_v30 = vadd.f32 %v938_v26, %v868_v14  ;;  %v943_v31 = vadd.f32 %v942_v23, %v871_v22 }
 0x206   :  { %v873_v32 = vmul.f32 %v546_v28, %v546_v28  ;;  %747 = vadd.xlane.f32.xlu1 %v746_v25  ;;  %v548_v33 = vpop.f32.mrb[37].mxu0  ;;  %v659_v34 = vpop.f32.mrb[36].mxu1 }
 0x207   :  { %v754_v35 = vadd.f32 %v548_v33, %v546_v28  ;;  %v874_v37 = vmul.f32 %v548_v33, %v548_v33  ;;  %v550_v38 = vpop.f32.mrb[38].mxu0  ;;  %v875_v39 = vmul.f32 %v659_v34, %v659_v34  ;;  %v661_v41 = vpop.f32.mrb[37].mxu1  ;;  %v944_v18 = vadd.f32 %v943_v31, %v872_v27 }
 0x208   :  { %v877_v36 = vmul.f32 %v550_v38, %v550_v38  ;;  %v552_v40 = vpop.f32.mrb[39].mxu0  ;;  %v876_v42 = vmul.f32 %v661_v41, %v661_v41  ;;  %v663_v43 = vpop.f32.mrb[38].mxu1 }
 0x209   :  { %v947_v44 = vadd.f32 %v874_v37, %v873_v32  ;;  %752 = vadd.xlane.f32.xlu0 %v751_v29  ;;  %v759_v45 = vadd.f32 %v552_v40, %v550_v38  ;;  %v878_v48 = vmul.f32 %v552_v40, %v552_v40  ;;  %v755_v49 = vadd.f32 %v754_v35, %v659_v34  ;;  %v665_v46 = vpop.f32.mrb[39].mxu1 }
 0x20a   :  { %v879_v50 = vmul.f32 %v663_v43, %v663_v43  ;;  %940 = vadd.xlane.f32.xlu1 %v939_v30  ;;  %v880_v54 = vmul.f32 %v665_v46, %v665_v46 }
 0x20b   :  { %v952_v51 = vadd.f32 %v878_v48, %v877_v36  ;;  %v760_v52 = vadd.f32 %v759_v45, %v663_v43  ;;  %v756_v19 = vadd.f32 %v755_v49, %v661_v41  ;;  %v948_v53 = vadd.f32 %v947_v44, %v875_v39 }
 0x20d   :  { %945 = vadd.xlane.f32.xlu0 %v944_v18  ;;  %v556_v55 = vpop.f32.mrb[40].mxu0  ;;  %v761_v56 = vadd.f32 %v760_v52, %v665_v46  ;;  %v949_v58 = vadd.f32 %v948_v53, %v876_v42  ;;  %v953_v47 = vadd.f32 %v952_v51, %v879_v50  ;;  %v688_v52 = vld [vmem:[%s1681_s4] sm:$0xff]  ;;  %v689_v53 = vld [vmem:[%s1681_s4 + $0x8] sm:$0xff] }
 0x20e   :  { %v881_v57 = vmul.f32 %v556_v55, %v556_v55  ;;  %757 = vadd.xlane.f32.xlu1 %v756_v19  ;;  %v558_v59 = vpop.f32.mrb[41].mxu0  ;;  %v669_v60 = vpop.f32.mrb[40].mxu1 }
 0x20f   :  { %v764_v61 = vadd.f32 %v558_v59, %v556_v55  ;;  %v882_v62 = vmul.f32 %v558_v59, %v558_v59  ;;  %v560_v63 = vpop.f32.mrb[42].mxu0  ;;  %v883_v0 = vmul.f32 %v669_v60, %v669_v60  ;;  %v671_v1 = vpop.f32.mrb[41].mxu1  ;;  %v954_v3 = vadd.f32 %v953_v47, %v880_v54 }
 0x210   :  { %v885_v4 = vmul.f32 %v560_v63, %v560_v63  ;;  %v562_v5 = vpop.f32.mrb[43].mxu0  ;;  %v884_v6 = vmul.f32 %v671_v1, %v671_v1  ;;  %v673_v7 = vpop.f32.mrb[42].mxu1 }
 0x211   :  { %v957_v8 = vadd.f32 %v882_v62, %v881_v57  ;;  %762 = vadd.xlane.f32.xlu0 %v761_v56  ;;  %v769_v9 = vadd.f32 %v562_v5, %v560_v63  ;;  %v886_v10 = vmul.f32 %v562_v5, %v562_v5  ;;  %v765_v11 = vadd.f32 %v764_v61, %v669_v60  ;;  %v675_v12 = vpop.f32.mrb[43].mxu1  ;;  %v818_v56 = vld [vmem:[%s1682_s5 + $0x8] sm:$0xff]  ;;  %v817_v57 = vld [vmem:[%s1682_s5] sm:$0xff]  ;;  %v690_v61 = vld [vmem:[%s1681_s4 + $0x10] sm:$0xff] }
 0x212   :  { %v887_v13 = vmul.f32 %v673_v7, %v673_v7  ;;  %950 = vadd.xlane.f32.xlu1 %v949_v58  ;;  %v888_v2 = vmul.f32 %v675_v12, %v675_v12 }
 0x213   :  { %v962_v14 = vadd.f32 %v886_v10, %v885_v4  ;;  %v770_v15 = vadd.f32 %v769_v9, %v673_v7  ;;  %v766_v16 = vadd.f32 %v765_v11, %v671_v1  ;;  %v958_v17 = vadd.f32 %v957_v8, %v883_v0  ;;  %v819_v0 = vld [vmem:[%s1682_s5 + $0x10] sm:$0xff]  ;;  %v820_v8 = vld [vmem:[%s1682_s5 + $0x18] sm:$0xff]  ;;  %v692_v9 = vld [vmem:[%s1681_s4 + $0x20] sm:$0xff] }
 0x215   :  { %955 = vadd.xlane.f32.xlu0 %v954_v3  ;;  %v566_v20 = vpop.f32.mrb[44].mxu0  ;;  %v771_v21 = vadd.f32 %v770_v15, %v675_v12  ;;  %v959_v22 = vadd.f32 %v958_v17, %v884_v6  ;;  %v963_v23 = vadd.f32 %v962_v14, %v887_v13  ;;  %v691_v3 = vld [vmem:[%s1681_s4 + $0x18] sm:$0xff]  ;;  %v693_v14 = vld [vmem:[%s1681_s4 + $0x28] sm:$0xff]  ;;  %v821_v15 = vld [vmem:[%s1682_s5 + $0x20] sm:$0xff] }
 0x216   :  { %v889_v24 = vmul.f32 %v566_v20, %v566_v20  ;;  %767 = vadd.xlane.f32.xlu1 %v766_v16  ;;  %v568_v25 = vpop.f32.mrb[45].mxu0  ;;  %v679_v26 = vpop.f32.mrb[44].mxu1 }
 0x217   :  { %v774_v27 = vadd.f32 %v568_v25, %v566_v20  ;;  %v890_v28 = vmul.f32 %v568_v25, %v568_v25  ;;  %v570_v29 = vpop.f32.mrb[46].mxu0  ;;  %v891_v30 = vmul.f32 %v679_v26, %v679_v26  ;;  %v681_v31 = vpop.f32.mrb[45].mxu1  ;;  %v964_v32 = vadd.f32 %v963_v23, %v888_v2 }
 0x218   :  { %v893_v33 = vmul.f32 %v570_v29, %v570_v29  ;;  %v572_v34 = vpop.f32.mrb[47].mxu0  ;;  %v892_v35 = vmul.f32 %v681_v31, %v681_v31  ;;  %v683_v37 = vpop.f32.mrb[46].mxu1 }
 0x219   :  { %v967_v38 = vadd.f32 %v890_v28, %v889_v24  ;;  %772 = vadd.xlane.f32.xlu0 %v771_v21  ;;  %v779_v39 = vadd.f32 %v572_v34, %v570_v29  ;;  %v894_v41 = vmul.f32 %v572_v34, %v572_v34  ;;  %v775_v18 = vadd.f32 %v774_v27, %v679_v26  ;;  %v685_v36 = vpop.f32.mrb[47].mxu1  ;;  %v822_v21 = vld [vmem:[%s1682_s5 + $0x28] sm:$0xff]  ;;  %v695_v27 = vld [vmem:[%s1681_s4 + $0x38] sm:$0xff]  ;;  %v823_v28 = vld [vmem:[%s1682_s5 + $0x30] sm:$0xff] }
 0x21a   :  { %v895_v40 = vmul.f32 %v683_v37, %v683_v37  ;;  %960 = vadd.xlane.f32.xlu1 %v959_v22  ;;  %v896_v49 = vmul.f32 %v685_v36, %v685_v36  ;;  %v694_v22 = vld [vmem:[%s1681_s4 + $0x30] sm:$0xff]  ;;  %v696_v34 = vld [vmem:[%s1681_s4 + $0x40] sm:$0xff] }
 0x21b   :  { %v972_v42 = vadd.f32 %v894_v41, %v893_v33  ;;  %v780_v43 = vadd.f32 %v779_v39, %v683_v37  ;;  %v776_v44 = vadd.f32 %v775_v18, %v681_v31  ;;  %v968_v45 = vadd.f32 %v967_v38, %v891_v30  ;;  %v824_v33 = vld [vmem:[%s1682_s5 + $0x38] sm:$0xff]  ;;  %v697_v41 = vld [vmem:[%s1681_s4 + $0x48] sm:$0xff]  ;;  %v825_v18 = vld [vmem:[%s1682_s5 + $0x40] sm:$0xff] }
 0x21d   :  { %965 = vadd.xlane.f32.xlu0 %v964_v32  ;;  %v781_v48 = vadd.f32 %v780_v43, %v685_v36  ;;  %v969_v46 = vadd.f32 %v968_v45, %v892_v35  ;;  %v973_v50 = vadd.f32 %v972_v42, %v895_v40  ;;  %v698_v45 = vld [vmem:[%s1681_s4 + $0x50] sm:$0xff] }
 0x21e   :  { %777 = vadd.xlane.f32.xlu1 %v776_v44  ;;  %v826_v44 = vld [vmem:[%s1682_s5 + $0x48] sm:$0xff] }
 0x21f   :  { %v974_v51 = vadd.f32 %v973_v50, %v896_v49 }
 0x221   :  { %782 = vadd.xlane.f32.xlu0 %v781_v48 }
 0x222   :  { %970 = vadd.xlane.f32.xlu1 %v969_v46 }
 0x225   :  { %975 = vadd.xlane.f32.xlu0 %v974_v51  ;;  %v699_v51 = vld [vmem:[%s1681_s4 + $0x58] sm:$0xff] }
 0x272   :  { %v708_v19 = vpop.xlane.xlu0 %707 }
 0x273   :  { %v784_v54 = vadd.f32 %v708_v19, %v688_v52  ;;  %v827_v52 = vld [vmem:[%s1682_s5 + $0x50] sm:$0xff] }
 0x274   :  { %v713_v55 = vpop.xlane.xlu1 %712 }
 0x275   :  { %801 = vst.msk [vmem:[%s1681_s4] sm:$0xff] %vm24_vm3, %v784_v54  ;;  %v785_v58 = vadd.f32 %v713_v55, %v689_v53 }
 0x276   :  { %v906_v47 = vpop.xlane.xlu0 %905 }
 0x277   :  { %802 = vst.msk [vmem:[%s1681_s4 + $0x8] sm:$0xff] %vm24_vm3, %v785_v58  ;;  %v978_v59 = vadd.f32 %v906_v47, %v818_v56  ;;  %v828_v56 = vld [vmem:[%s1682_s5 + $0x58] sm:$0xff]  ;;  %v700_v58 = vld [vmem:[%s1681_s4 + $0x60] sm:$0xff] }
 0x278   :  { %v901_v60 = vpop.xlane.xlu1 %900 }
 0x279   :  { %994 = vst.msk [vmem:[%s1682_s5 + $0x8] sm:$0xff] %vm24_vm3, %v978_v59  ;;  %v977_v62 = vadd.f32 %v901_v60, %v817_v57 }
 0x27a   :  { %v718_v63 = vpop.xlane.xlu0 %717 }
 0x27b   :  { %993 = vst.msk [vmem:[%s1682_s5] sm:$0xff] %vm24_vm3, %v977_v62  ;;  %v786_v1 = vadd.f32 %v718_v63, %v690_v61  ;;  %v701_v61 = vld [vmem:[%s1681_s4 + $0x68] sm:$0xff]  ;;  %v829_v62 = vld [vmem:[%s1682_s5 + $0x60] sm:$0xff] }
 0x27c   :  { %v911_v4 = vpop.xlane.xlu1 %910 }
 0x27d   :  { %803 = vst.msk [vmem:[%s1681_s4 + $0x10] sm:$0xff] %vm24_vm3, %v786_v1  ;;  %v979_v5 = vadd.f32 %v911_v4, %v819_v0  ;;  %v830_v4 = vld [vmem:[%s1682_s5 + $0x68] sm:$0xff] }
 0x27e   :  { %v723_v6 = vpop.xlane.xlu0 %722 }
 0x27f   :  { %v787_v7 = vadd.f32 %v723_v6, %v691_v3  ;;  %995 = vst.msk [vmem:[%s1682_s5 + $0x10] sm:$0xff] %vm24_vm3, %v979_v5  ;;  %v702_v5 = vld [vmem:[%s1681_s4 + $0x70] sm:$0xff] }
 0x281   :  { %804 = vst.msk [vmem:[%s1681_s4 + $0x18] sm:$0xff] %vm24_vm3, %v787_v7 }
 0x282   :  { %v916_v10 = vpop.xlane.xlu0 %915  ;;  %v728_v11 = vpop.xlane.xlu1 %727 }
 0x283   :  { %v980_v12 = vadd.f32 %v916_v10, %v820_v8  ;;  %v788_v13 = vadd.f32 %v728_v11, %v692_v9  ;;  %v703_v10 = vld [vmem:[%s1681_s4 + $0x78] sm:$0xff]  ;;  %v831_v11 = vld [vmem:[%s1682_s5 + $0x70] sm:$0xff] }
 0x285   :  { %996 = vst.msk [vmem:[%s1682_s5 + $0x18] sm:$0xff] %vm24_vm3, %v980_v12  ;;  %805 = vst.msk [vmem:[%s1681_s4 + $0x20] sm:$0xff] %vm24_vm3, %v788_v13 }
 0x286   :  { %v733_v16 = vpop.xlane.xlu0 %732 }
 0x287   :  { %v789_v17 = vadd.f32 %v733_v16, %v693_v14  ;;  %v921_v2 = vpop.xlane.xlu1 %920  ;;  %v832_v16 = vld [vmem:[%s1682_s5 + $0x78] sm:$0xff] }
 0x288   :  { %v981_v20 = vadd.f32 %v921_v2, %v821_v15 }
 0x289   :  { %806 = vst.msk [vmem:[%s1681_s4 + $0x28] sm:$0xff] %vm24_vm3, %v789_v17 }
 0x28a   :  { %997 = vst.msk [vmem:[%s1682_s5 + $0x20] sm:$0xff] %vm24_vm3, %v981_v20  ;;  %v926_v23 = vpop.xlane.xlu0 %925 }
 0x28b   :  { %v982_v24 = vadd.f32 %v926_v23, %v822_v21  ;;  %v738_v25 = vpop.xlane.xlu1 %737 }
 0x28c   :  { %v790_v26 = vadd.f32 %v738_v25, %v694_v22 }
 0x28d   :  { %998 = vst.msk [vmem:[%s1682_s5 + $0x28] sm:$0xff] %vm24_vm3, %v982_v24 }
 0x28e   :  { %807 = vst.msk [vmem:[%s1681_s4 + $0x30] sm:$0xff] %vm24_vm3, %v790_v26  ;;  %v743_v29 = vpop.xlane.xlu0 %742 }
 0x28f   :  { %v791_v30 = vadd.f32 %v743_v29, %v695_v27  ;;  %v931_v31 = vpop.xlane.xlu1 %930 }
 0x290   :  { %v983_v32 = vadd.f32 %v931_v31, %v823_v28 }
 0x291   :  { %808 = vst.msk [vmem:[%s1681_s4 + $0x38] sm:$0xff] %vm24_vm3, %v791_v30 }
 0x292   :  { %999 = vst.msk [vmem:[%s1682_s5 + $0x30] sm:$0xff] %vm24_vm3, %v983_v32  ;;  %v936_v35 = vpop.xlane.xlu0 %935 }
 0x293   :  { %v984_v37 = vadd.f32 %v936_v35, %v824_v33  ;;  %v748_v38 = vpop.xlane.xlu1 %747 }
 0x294   :  { %v792_v39 = vadd.f32 %v748_v38, %v696_v34 }
 0x295   :  { %1000 = vst.msk [vmem:[%s1682_s5 + $0x38] sm:$0xff] %vm24_vm3, %v984_v37 }
 0x296   :  { %809 = vst.msk [vmem:[%s1681_s4 + $0x40] sm:$0xff] %vm24_vm3, %v792_v39  ;;  %v753_v36 = vpop.xlane.xlu0 %752 }
 0x297   :  { %v793_v40 = vadd.f32 %v753_v36, %v697_v41  ;;  %v941_v42 = vpop.xlane.xlu1 %940 }
 0x298   :  { %v985_v43 = vadd.f32 %v941_v42, %v825_v18 }
 0x299   :  { %810 = vst.msk [vmem:[%s1681_s4 + $0x48] sm:$0xff] %vm24_vm3, %v793_v40 }
 0x29a   :  { %1001 = vst.msk [vmem:[%s1682_s5 + $0x40] sm:$0xff] %vm24_vm3, %v985_v43  ;;  %v946_v48 = vpop.xlane.xlu0 %945 }
 0x29b   :  { %v986_v49 = vadd.f32 %v946_v48, %v826_v44  ;;  %v758_v46 = vpop.xlane.xlu1 %757 }
 0x29c   :  { %v794_v50 = vadd.f32 %v758_v46, %v698_v45 }
 0x29d   :  { %1002 = vst.msk [vmem:[%s1682_s5 + $0x48] sm:$0xff] %vm24_vm3, %v986_v49 }
 0x29e   :  { %811 = vst.msk [vmem:[%s1681_s4 + $0x50] sm:$0xff] %vm24_vm3, %v794_v50  ;;  %v763_v19 = vpop.xlane.xlu0 %762 }
 0x29f   :  { %v795_v53 = vadd.f32 %v763_v19, %v699_v51  ;;  %v951_v54 = vpop.xlane.xlu1 %950 }
 0x2a0   :  { %v987_v55 = vadd.f32 %v951_v54, %v827_v52 }
 0x2a1   :  { %812 = vst.msk [vmem:[%s1681_s4 + $0x58] sm:$0xff] %vm24_vm3, %v795_v53 }
 0x2a2   :  { %1003 = vst.msk [vmem:[%s1682_s5 + $0x50] sm:$0xff] %vm24_vm3, %v987_v55  ;;  %v956_v47 = vpop.xlane.xlu0 %955 }
 0x2a3   :  { %v988_v57 = vadd.f32 %v956_v47, %v828_v56  ;;  %v768_v59 = vpop.xlane.xlu1 %767 }
 0x2a4   :  { %v796_v60 = vadd.f32 %v768_v59, %v700_v58 }
 0x2a5   :  { %1004 = vst.msk [vmem:[%s1682_s5 + $0x58] sm:$0xff] %vm24_vm3, %v988_v57 }
 0x2a6   :  { %813 = vst.msk [vmem:[%s1681_s4 + $0x60] sm:$0xff] %vm24_vm3, %v796_v60  ;;  %v773_v63 = vpop.xlane.xlu0 %772 }
 0x2a7   :  { %v797_v0 = vadd.f32 %v773_v63, %v701_v61  ;;  %v961_v1 = vpop.xlane.xlu1 %960 }
 0x2a8   :  { %v989_v3 = vadd.f32 %v961_v1, %v829_v62 }
 0x2a9   :  { %814 = vst.msk [vmem:[%s1681_s4 + $0x68] sm:$0xff] %vm24_vm3, %v797_v0 }
 0x2aa   :  { %1005 = vst.msk [vmem:[%s1682_s5 + $0x60] sm:$0xff] %vm24_vm3, %v989_v3  ;;  %v966_v6 = vpop.xlane.xlu0 %965 }
 0x2ab   :  { %v990_v7 = vadd.f32 %v966_v6, %v830_v4  ;;  %v778_v8 = vpop.xlane.xlu1 %777 }
 0x2ac   :  { %v798_v9 = vadd.f32 %v778_v8, %v702_v5 }
 0x2ad   :  { %1006 = vst.msk [vmem:[%s1682_s5 + $0x68] sm:$0xff] %vm24_vm3, %v990_v7 }
 0x2ae   :  { %815 = vst.msk [vmem:[%s1681_s4 + $0x70] sm:$0xff] %vm24_vm3, %v798_v9  ;;  %v783_v12 = vpop.xlane.xlu0 %782 }
 0x2af   :  { %v799_v13 = vadd.f32 %v783_v12, %v703_v10  ;;  %v971_v14 = vpop.xlane.xlu1 %970 }
 0x2b0   :  { %v991_v15 = vadd.f32 %v971_v14, %v831_v11 }
 0x2b1   :  { %816 = vst.msk [vmem:[%s1681_s4 + $0x78] sm:$0xff] %vm24_vm3, %v799_v13 }
 0x2b2   :  { %1007 = vst.msk [vmem:[%s1682_s5 + $0x70] sm:$0xff] %vm24_vm3, %v991_v15  ;;  %v976_v17 = vpop.xlane.xlu0 %975 }
 0x2b3   :  { %v992_v2 = vadd.f32 %v976_v17, %v832_v16 }
 0x2b5   :  { %1008 = vst.msk [vmem:[%s1682_s5 + $0x78] sm:$0xff] %vm24_vm3, %v992_v2 }

</bundles_post_ra>
